<compile_context>
chip_gen: v7x
topology: tpu7x:2x2x1
jax: 0.10.0
libtpu: 0.0.40
codegen_flags: <defaults>
</compile_context>

<pallas_src>
import functools
import math

import jax
import jax.numpy as jnp
from jax.experimental import pallas as pl
from jax.experimental.pallas import tpu as pltpu

# Keep f32 matmuls genuinely f32 on both the XLA reference path and the Pallas path.
jax.config.update("jax_default_matmul_precision", "highest")


# ----------------------------------------------------------------------------
# Device-dependent tiling / VMEM knobs
# ----------------------------------------------------------------------------

def _device_kind():
    try:
        return jax.devices()[0].device_kind.lower()
    except Exception:
        return ""


def _round_up(x, m):
    return ((x + m - 1) // m) * m


def _tile_m_default():
    kind = _device_kind()
    if "v6" in kind:
        return 512        # 128 MiB VMEM: bigger token tiles amortize per-step overhead
    return 256            # v5e stays at 256; v7x (64 MiB VMEM) stays at 256


def _tile_h_default():
    return 1024 if "v6" in _device_kind() else 512


def _vmem_cap():
    kind = _device_kind()
    if "v5" in kind or "v6" in kind:
        return 96 << 20   # 128 MiB physical
    return 48 << 20       # v7x has 64 MiB physical; safe default elsewhere


def _vmem_limit(bytes_needed):
    return int(min(max(2 * int(bytes_needed) + (4 << 20), 16 << 20), _vmem_cap()))


def _mlp_tiles(hidden):
    th = min(_tile_h_default(), _round_up(hidden, 128))
    return th, _round_up(hidden, th)


def _gelu_f32(x, approximate=False):
    # Exact erf matches nn.GELU() default; tanh variant (optional) routes through the EUP.
    if approximate:
        return jax.nn.gelu(x, approximate=True)
    return 0.5 * x * (1.0 + jax.lax.erf(x * (1.0 / math.sqrt(2.0))))


def _layernorm_rows(x, gamma, beta, d_valid, eps):
    """f32 LayerNorm over the last dim of a (possibly feature-padded) tile.
    Padded columns (>= d_valid) carry gamma == beta == 0 and come out exactly 0."""
    if d_valid == x.shape[-1]:
        mean = jnp.mean(x, axis=-1, keepdims=True)
        xc = x - mean
        var = jnp.mean(xc * xc, axis=-1, keepdims=True)
    else:
        col = jax.lax.broadcasted_iota(jnp.int32, x.shape, 1)
        valid = col < d_valid
        xm = jnp.where(valid, x, 0.0)
        mean = jnp.sum(xm, axis=-1, keepdims=True) * (1.0 / d_valid)
        xc = jnp.where(valid, xm - mean, 0.0)
        var = jnp.sum(xc * xc, axis=-1, keepdims=True) * (1.0 / d_valid)
    return xc * jax.lax.rsqrt(var + eps) * gamma + beta


# ----------------------------------------------------------------------------
# Kernels
# ----------------------------------------------------------------------------

def _linear_kernel(x_ref, w_ref, b_ref, o_ref, *, compute_dtype):
    x = x_ref[...]
    if compute_dtype is not None and x.dtype != compute_dtype:
        x = x.astype(compute_dtype)
    y = jnp.dot(x, w_ref[...], preferred_element_type=jnp.float32) + b_ref[...]
    o_ref[...] = y.astype(o_ref.dtype)


def _linear_resid_kernel(x_ref, r_ref, w_ref, b_ref, o_ref, *, compute_dtype):
    x = x_ref[...]
    if compute_dtype is not None and x.dtype != compute_dtype:
        x = x.astype(compute_dtype)
    y = jnp.dot(x, w_ref[...], preferred_element_type=jnp.float32) + b_ref[...]
    o_ref[...] = (y + r_ref[...].astype(jnp.float32)).astype(o_ref.dtype)


def _ln_linear_kernel(x_ref, g_ref, bln_ref, w_ref, b_ref, o_ref, *,
                      d_valid, eps, compute_dtype):
    x = x_ref[...].astype(jnp.float32)
    y = _layernorm_rows(x, g_ref[...], bln_ref[...], d_valid, eps)
    if compute_dtype is not None:
        y = y.astype(compute_dtype)
    o = jnp.dot(y, w_ref[...], preferred_element_type=jnp.float32) + b_ref[...]
    o_ref[...] = o.astype(o_ref.dtype)


def _ln_mlp_resid_kernel(x_ref, g_ref, bln_ref, w1_ref, b1_ref, w2_ref, b2_ref,
                         o_ref, acc_ref, xn_ref, *, d_valid, eps, approximate_gelu):
    h_idx = pl.program_id(1)

    @pl.when(h_idx == 0)
    def _():
        x = x_ref[...].astype(jnp.float32)
        y = _layernorm_rows(x, g_ref[...], bln_ref[...], d_valid, eps)
        xn_ref[...] = y.astype(xn_ref.dtype)
        acc_ref[...] = jnp.zeros_like(acc_ref)

    hdn = jnp.dot(xn_ref[...], w1_ref[...], preferred_element_type=jnp.float32) + b1_ref[...]
    hdn = _gelu_f32(hdn, approximate=approximate_gelu)
    acc_ref[...] += jnp.dot(hdn.astype(w2_ref.dtype), w2_ref[...],
                            preferred_element_type=jnp.float32)

    @pl.when(h_idx == pl.num_programs(1) - 1)
    def _():
        o_ref[...] = (acc_ref[...] + b2_ref[...]
                      + x_ref[...].astype(jnp.float32)).astype(o_ref.dtype)


def _attn_kernel(q_ref, k_ref, v_ref, o_ref, *, scale, n_valid, approx_recip):
    q = q_ref[0]                                        # (tq, e_p)
    k = k_ref[0]                                        # (n_pad, e_p)
    v = v_ref[0]
    s = jax.lax.dot_general(q, k, (((1,), (1,)), ((), ())),
                            preferred_element_type=jnp.float32) * scale
    col = jax.lax.broadcasted_iota(jnp.int32, s.shape, 1)
    s = jnp.where(col < n_valid, s, -1e30)              # mask padded key columns
    m = jnp.max(s, axis=-1, keepdims=True)
    p = jnp.exp(s - m)
    l = jnp.sum(p, axis=-1, keepdims=True)
    o = jnp.dot(p.astype(v.dtype), v, preferred_element_type=jnp.float32)
    # normalization deferred past the PV matmul: (tq x e_p) elementwise instead of (tq x n_pad)
    o = o * pl.reciprocal(l, approx=approx_recip)
    o_ref[0] = o.astype(o_ref.dtype)


# ----------------------------------------------------------------------------
# Wrappers
# ----------------------------------------------------------------------------

def _flatten_leading(x):
    m = math.prod(x.shape[:-1]) if x.ndim > 1 else 1
    return x.reshape(m, x.shape[-1]), x.shape, m


def linear_pallas(x, w_p, b_p, *, residual=None, out_dtype=jnp.float32, compute_dtype=None):
    """out = x @ W + b (+ residual). W/b pre-padded to (d_in_p, d_out_p)/(1, d_out_p)."""
    x2, shape, m = _flatten_leading(x)
    d_in = x2.shape[-1]
    d_in_p, d_out_p = w_p.shape
    tm = min(_tile_m_default(), _round_up(m, 8))
    m_pad = _round_up(m, tm)
    x2 = jnp.pad(x2, ((0, m_pad - m), (0, d_in_p - d_in)))

    inputs = [x2]
    in_specs = [pl.BlockSpec((tm, d_in_p), lambda i: (i, 0))]
    if residual is not None:
        r2, _, _ = _flatten_leading(residual)
        r2 = jnp.pad(r2, ((0, m_pad - m), (0, d_out_p - r2.shape[-1])))
        inputs.append(r2)
        in_specs.append(pl.BlockSpec((tm, d_out_p), lambda i: (i, 0)))
    inputs += [w_p, b_p]
    in_specs += [pl.BlockSpec((d_in_p, d_out_p), lambda i: (0, 0)),    # resident weights
                 pl.BlockSpec((1, d_out_p), lambda i: (0, 0))]         # resident bias

    kern = _linear_resid_kernel if residual is not None else _linear_kernel
    wsz = jnp.dtype(w_p.dtype).itemsize
    xsz = jnp.dtype(x2.dtype).itemsize
    osz = jnp.dtype(out_dtype).itemsize
    fp = (2 * d_in_p * d_out_p * wsz + 2 * tm * d_in_p * xsz + 2 * tm * d_out_p * osz
          + 4 * d_out_p + (2 * tm * d_out_p * 4 if residual is not None else 0))

    out = pl.pallas_call(
        functools.partial(kern, compute_dtype=compute_dtype),
        out_shape=jax.ShapeDtypeStruct((m_pad, d_out_p), out_dtype),
        grid_spec=pl.GridSpec(
            grid=(m_pad // tm,),
            in_specs=in_specs,
            out_specs=pl.BlockSpec((tm, d_out_p), lambda i: (i, 0)),
        ),
        compiler_params=pltpu.CompilerParams(
            dimension_semantics=("parallel",),
            vmem_limit_bytes=_vmem_limit(fp),
        ),
        cost_estimate=pl.CostEstimate(
            flops=int(2 * m_pad * d_in_p * d_out_p), transcendentals=0,
            bytes_accessed=int(xsz * m_pad * d_in_p + wsz * d_in_p * d_out_p
                               + osz * m_pad * d_out_p),
        ),
    )(*inputs)
    if m_pad != m:
        out = out[:m]
    return out.reshape(*shape[:-1], d_out_p)


def ln_linear_pallas(x, g_p, bln_p, w_p, b_p, *, d_valid, eps=1e-6,
                     out_dtype=jnp.float32, compute_dtype=None):
    """LayerNorm (over first d_valid features) fused into x @ W + b."""
    x2, shape, m = _flatten_leading(x)
    d_in = x2.shape[-1]
    d_in_p, d_out_p = w_p.shape
    tm = min(_tile_m_default(), _round_up(m, 8))
    m_pad = _round_up(m, tm)
    x2 = jnp.pad(x2, ((0, m_pad - m), (0, d_in_p - d_in)))

    wsz = jnp.dtype(w_p.dtype).itemsize
    fp = (2 * d_in_p * d_out_p * wsz + 2 * tm * d_in_p * 4
          + 2 * tm * d_out_p * jnp.dtype(out_dtype).itemsize + 4 * (2 * d_in_p + d_out_p))

    out = pl.pallas_call(
        functools.partial(_ln_linear_kernel, d_valid=d_valid, eps=eps,
                          compute_dtype=compute_dtype),
        out_shape=jax.ShapeDtypeStruct((m_pad, d_out_p), out_dtype),
        grid_spec=pl.GridSpec(
            grid=(m_pad // tm,),
            in_specs=[
                pl.BlockSpec((tm, d_in_p), lambda i: (i, 0)),
                pl.BlockSpec((1, d_in_p), lambda i: (0, 0)),
                pl.BlockSpec((1, d_in_p), lambda i: (0, 0)),
                pl.BlockSpec((d_in_p, d_out_p), lambda i: (0, 0)),
                pl.BlockSpec((1, d_out_p), lambda i: (0, 0)),
            ],
            out_specs=pl.BlockSpec((tm, d_out_p), lambda i: (i, 0)),
        ),
        compiler_params=pltpu.CompilerParams(
            dimension_semantics=("parallel",),
            vmem_limit_bytes=_vmem_limit(fp),
        ),
        cost_estimate=pl.CostEstimate(
            flops=int(2 * m_pad * d_in_p * d_out_p), transcendentals=0,
            bytes_accessed=int(4 * m_pad * d_in_p + wsz * d_in_p * d_out_p
                               + jnp.dtype(out_dtype).itemsize * m_pad * d_out_p),
        ),
    )(x2, g_p, bln_p, w_p, b_p)
    if m_pad != m:
        out = out[:m]
    return out.reshape(*shape[:-1], d_out_p)


def ln_mlp_pallas(x, g_p, bln_p, w1_p, b1_p, w2_p, b2_p, *, th, d_valid, eps=1e-6,
                  compute_dtype=None, approximate_gelu=False):
    """x + MLP(LayerNorm(x)) with the hidden dim streamed in th-chunks (f32 accumulator)."""
    x2, shape, m = _flatten_leading(x)
    d_in = x2.shape[-1]
    d_in_p, h_pad = w1_p.shape
    d_out_p = w2_p.shape[1]
    tm = min(_tile_m_default(), _round_up(m, 8))
    m_pad = _round_up(m, tm)
    x2 = jnp.pad(x2, ((0, m_pad - m), (0, d_in_p - d_in)))
    cdt = compute_dtype if compute_dtype is not None else jnp.float32
    wsz = jnp.dtype(w1_p.dtype).itemsize
    fp = (2 * (d_in_p * th + th * d_out_p) * wsz + 2 * tm * d_in_p * 4
          + 2 * tm * d_out_p * 4 + tm * d_out_p * 4
          + tm * d_in_p * jnp.dtype(cdt).itemsize + 4 * (th + d_out_p + 2 * d_in_p))

    out = pl.pallas_call(
        functools.partial(_ln_mlp_resid_kernel, d_valid=d_valid, eps=eps,
                          approximate_gelu=approximate_gelu),
        out_shape=jax.ShapeDtypeStruct((m_pad, d_out_p), jnp.float32),
        grid_spec=pltpu.PrefetchScalarGridSpec(
            num_scalar_prefetch=0,
            grid=(m_pad // tm, h_pad // th),
            in_specs=[
                pl.BlockSpec((tm, d_in_p), lambda i, h: (i, 0)),
                pl.BlockSpec((1, d_in_p), lambda i, h: (0, 0)),
                pl.BlockSpec((1, d_in_p), lambda i, h: (0, 0)),
                pl.BlockSpec((d_in_p, th), lambda i, h: (0, h)),     # stream W1 hidden chunks
                pl.BlockSpec((1, th), lambda i, h: (0, h)),
                pl.BlockSpec((th, d_out_p), lambda i, h: (h, 0)),    # stream W2 hidden chunks
                pl.BlockSpec((1, d_out_p), lambda i, h: (0, 0)),
            ],
            out_specs=pl.BlockSpec((tm, d_out_p), lambda i, h: (i, 0)),
            scratch_shapes=[pltpu.VMEM((tm, d_out_p), jnp.float32),
                            pltpu.VMEM((tm, d_in_p), cdt)],
        ),
        compiler_params=pltpu.CompilerParams(
            dimension_semantics=("parallel", "arbitrary"),
            vmem_limit_bytes=_vmem_limit(fp),
        ),
        cost_estimate=pl.CostEstimate(
            flops=int(2 * m_pad * d_in_p * h_pad + 2 * m_pad * h_pad * d_out_p),
            transcendentals=int(m_pad * h_pad),
            bytes_accessed=int(4 * m_pad * d_in_p + wsz * (d_in_p * h_pad + h_pad * d_out_p)
                               + 4 * m_pad * d_out_p),
        ),
    )(x2, g_p, bln_p, w1_p, b1_p, w2_p, b2_p)
    if m_pad != m:
        out = out[:m]
    return out.reshape(*shape[:-1], d_out_p)


def attention_pallas(qkv, *, scale, approx_recip=False):
    """softmax(q k^T * scale) v with q/k/v read straight out of the fused (B,N,3*e_p) tensor."""
    b, n, three_ep = qkv.shape
    e_p = three_ep // 3
    n_pad = _round_up(n, 128)
    tq = min(128, n_pad)
    qkv_p = jnp.pad(qkv, ((0, 0), (0, n_pad - n), (0, 0))) if n_pad != n else qkv
    it = jnp.dtype(qkv.dtype).itemsize
    fp = it * (2 * tq * e_p + 4 * n_pad * e_p + 2 * tq * e_p) + 4 * tq * n_pad * 2

    out = pl.pallas_call(
        functools.partial(_attn_kernel, scale=float(scale), n_valid=n,
                          approx_recip=approx_recip),
        out_shape=jax.ShapeDtypeStruct((b, n_pad, e_p), qkv.dtype),
        grid_spec=pl.GridSpec(
            grid=(b, n_pad // tq),
            in_specs=[
                pl.BlockSpec((1, tq, e_p), lambda bi, qi: (bi, qi, 0)),     # q tile
                pl.BlockSpec((1, n_pad, e_p), lambda bi, qi: (bi, 0, 1)),   # full k
                pl.BlockSpec((1, n_pad, e_p), lambda bi, qi: (bi, 0, 2)),   # full v
            ],
            out_specs=pl.BlockSpec((1, tq, e_p), lambda bi, qi: (bi, qi, 0)),
        ),
        compiler_params=pltpu.CompilerParams(
            dimension_semantics=("parallel", "parallel"),
            vmem_limit_bytes=_vmem_limit(fp),
        ),
    )(qkv_p, qkv_p, qkv_p)
    return out[:, :n, :]


# ----------------------------------------------------------------------------
# Parameter preparation (pad + cast ONCE, not per forward call)
# ----------------------------------------------------------------------------

def prepare_params(params, cfg, compute_dtype=None):
    wdt = compute_dtype if compute_dtype is not None else jnp.float32
    e = cfg["embed_dim"]
    e_p = _round_up(e, 128)
    cpp = cfg["in_c"] * cfg["patch_size"] ** 2
    cpp_p = _round_up(cpp, 128)
    hidden = int(e * cfg["mlp_ratio"])
    th, h_pad = _mlp_tiles(hidden)

    def pad_w(w, rp, cp):
        return jnp.pad(w, ((0, rp - w.shape[0]), (0, cp - w.shape[1]))).astype(wdt)

    def pad_b(v, cp):
        v = v.reshape(1, -1)
        return jnp.pad(v, ((0, 0), (0, cp - v.shape[1]))).astype(jnp.float32)

    pw = params["patch_w"].reshape(e, cpp).T                      # (c*p*p, e)
    pp = dict(
        e=e, e_p=e_p, th=th,
        patch_w=pad_w(pw, cpp_p, e_p), patch_b=pad_b(params["patch_b"], e_p),
        cls_token=jnp.pad(params["cls_token"], ((0, 0), (0, 0), (0, e_p - e))),
        pos_embed=jnp.pad(params["pos_embed"], ((0, 0), (0, 0), (0, e_p - e))),
        norm_g=params["norm_g"], norm_b=params["norm_b"],
        head_w=params["head_w"], head_b=params["head_b"],
        blocks=[],
    )
    for blk in params["blocks"]:
        wq, wk, wv = jnp.split(blk["qkv_w"], 3, axis=1)
        bq, bk, bv = jnp.split(blk["qkv_b"], 3)
        pp["blocks"].append(dict(
            ln1_g=pad_b(blk["ln1_g"], e_p), ln1_b=pad_b(blk["ln1_b"], e_p),
            qkv_w=jnp.concatenate([pad_w(wq, e_p, e_p), pad_w(wk, e_p, e_p),
                                   pad_w(wv, e_p, e_p)], axis=1),
            qkv_b=jnp.concatenate([pad_b(bq, e_p), pad_b(bk, e_p), pad_b(bv, e_p)], axis=1),
            proj_w=pad_w(blk["proj_w"], e_p, e_p), proj_b=pad_b(blk["proj_b"], e_p),
            ln2_g=pad_b(blk["ln2_g"], e_p), ln2_b=pad_b(blk["ln2_b"], e_p),
            fc1_w=pad_w(blk["fc1_w"], e_p, h_pad), fc1_b=pad_b(blk["fc1_b"], h_pad),
            fc2_w=pad_w(blk["fc2_w"], h_pad, e_p), fc2_b=pad_b(blk["fc2_b"], e_p),
        ))
    return pp


# ----------------------------------------------------------------------------
# VisionTransformer forward (glue in JAX, compute in the kernels above)
# ----------------------------------------------------------------------------

def _extract_patches(x, p):
    """Conv2d(kernel=stride=patch_size) == per-patch linear projection."""
    b, c, hgt, wid = x.shape
    gh, gw = hgt // p, wid // p
    pat = x.reshape(b, c, gh, p, gw, p).transpose(0, 2, 4, 1, 3, 5)
    return pat.reshape(b, gh * gw, c * p * p)


def _layernorm_ref(x, g, b, *, eps=1e-6):
    mean = jnp.mean(x, axis=-1, keepdims=True)
    xc = x - mean
    var = jnp.mean(xc * xc, axis=-1, keepdims=True)
    return xc * jax.lax.rsqrt(var + eps) * g + b


def vit_forward_pallas(pp, x, cfg, *, compute_dtype=None, approximate_gelu=False):
    dt = compute_dtype
    act_dt = dt if dt is not None else jnp.float32
    bsz = x.shape[0]
    e, e_p = pp["e"], pp["e_p"]
    scale = float((e // cfg["num_heads"]) ** -0.5)
    eps = 1e-6

    patches = _extract_patches(x, cfg["patch_size"])
    tok = linear_pallas(patches, pp["patch_w"], pp["patch_b"], compute_dtype=dt)   # (B, np, e_p) f32
    cls = jnp.broadcast_to(pp["cls_token"], (bsz, 1, e_p))
    h = jnp.concatenate([cls, tok], axis=1) + pp["pos_embed"]   # pos_drop(p=0) is identity
    n = h.shape[1]

    for blk in pp["blocks"]:
        # LN1 fused into the QKV projection (q|k|v each padded to e_p columns, no jnp.split later).
        qkv = ln_linear_pallas(h, blk["ln1_g"], blk["ln1_b"], blk["qkv_w"], blk["qkv_b"],
                               d_valid=e, eps=eps, out_dtype=act_dt, compute_dtype=dt)
        a = attention_pallas(qkv, scale=scale, approx_recip=dt is not None)        # (B, n, e_p)
        # PyTorch: (attn @ v).transpose(1, 2).reshape(B, N, C) with NO head split — a pure layout
        # scramble when N != C, kept in XLA for exact fidelity to the module.
        a = a[:, :, :e].transpose(0, 2, 1).reshape(bsz, n, e)
        # proj matmul with the residual add fused into the output tile write.
        h = linear_pallas(a, blk["proj_w"], blk["proj_b"], residual=h,
                          out_dtype=jnp.float32, compute_dtype=dt)
        # LN2 + GELU-MLP + residual in one fused kernel.
        h = ln_mlp_pallas(h, blk["ln2_g"], blk["ln2_b"], blk["fc1_w"], blk["fc1_b"],
                          blk["fc2_w"], blk["fc2_b"], th=pp["th"], d_valid=e, eps=eps,
                          compute_dtype=dt, approximate_gelu=approximate_gelu)

    # Final LN (cls row only — LN is per-row) + tiny head: plain XLA on purpose (trivial size).
    cls_out = _layernorm_ref(h[:, 0, :e], pp["norm_g"], pp["norm_b"], eps=eps)
    return jnp.dot(cls_out, pp["head_w"]) + pp["head_b"]


# ----------------------------------------------------------------------------
# Pure-JAX reference (mirrors the module; optional bf16 casts mirror the kernel path)
# ----------------------------------------------------------------------------

def vit_forward_ref(params, x, cfg, compute_dtype=None):
    dt = compute_dtype

    def cast(a):
        return a if dt is None else a.astype(dt)

    e = cfg["embed_dim"]
    scale = float((e // cfg["num_heads"]) ** -0.5)
    eps = 1e-6
    bsz = x.shape[0]

    patches = _extract_patches(x, cfg["patch_size"])
    w2d = params["patch_w"].reshape(e, -1).T
    tok = jnp.dot(cast(patches), cast(w2d), preferred_element_type=jnp.float32) + params["patch_b"]
    cls = jnp.broadcast_to(params["cls_token"], (bsz, 1, e))
    h = jnp.concatenate([cls, tok], axis=1) + params["pos_embed"]
    n = h.shape[1]

    for blk in params["blocks"]:
        y = _layernorm_ref(h, blk["ln1_g"], blk["ln1_b"], eps=eps)
        qkv = jnp.dot(cast(y), cast(blk["qkv_w"]), preferred_element_type=jnp.float32) + blk["qkv_b"]
        qkv = cast(qkv)
        q, k, v = jnp.split(qkv, 3, axis=-1)
        s = jnp.einsum("bnc,bmc->bnm", q, k, preferred_element_type=jnp.float32) * scale
        s = s - jnp.max(s, axis=-1, keepdims=True)
        p = jnp.exp(s)
        p = p / jnp.sum(p, axis=-1, keepdims=True)
        a = jnp.einsum("bnm,bmc->bnc", cast(p), v, preferred_element_type=jnp.float32)
        a = cast(a)
        a = a.transpose(0, 2, 1).reshape(bsz, n, e)
        h = h + (jnp.dot(cast(a), cast(blk["proj_w"]), preferred_element_type=jnp.float32)
                 + blk["proj_b"])
        y = _layernorm_ref(h, blk["ln2_g"], blk["ln2_b"], eps=eps)
        hid = jnp.dot(cast(y), cast(blk["fc1_w"]), preferred_element_type=jnp.float32) + blk["fc1_b"]
        hid = _gelu_f32(hid)
        h = h + (jnp.dot(cast(hid), cast(blk["fc2_w"]), preferred_element_type=jnp.float32)
                 + blk["fc2_b"])

    cls_out = _layernorm_ref(h[:, 0], params["norm_g"], params["norm_b"], eps=eps)
    return jnp.dot(cls_out, params["head_w"]) + params["head_b"]


# ----------------------------------------------------------------------------
# Parameter init (deterministic; weight layout (in, out) so kernels do plain x @ W)
# ----------------------------------------------------------------------------

def init_vit_params(key, cfg):
    e = cfg["embed_dim"]
    c = cfg["in_c"]
    p = cfg["patch_size"]
    depth = cfg["depth"]
    hidden = int(e * cfg["mlp_ratio"])
    ncls = cfg["num_classes"]
    num_patches = (cfg["img_size"] // p) ** 2

    keys = jax.random.split(key, 8 + depth)

    def nrm(k, shape, std):
        return (std * jax.random.normal(k, shape)).astype(jnp.float32)

    params = dict(
        patch_w=nrm(keys[0], (e, c, p, p), 0.05),
        patch_b=nrm(keys[1], (e,), 0.02),
        cls_token=nrm(keys[2], (1, 1, e), 0.02),
        pos_embed=nrm(keys[3], (1, num_patches + 1, e), 0.02),
        norm_g=jnp.ones((e,), jnp.float32),
        norm_b=nrm(keys[4], (e,), 0.02),
        head_w=nrm(keys[5], (e, ncls), 0.01),
        head_b=nrm(keys[6], (ncls,), 0.02),
        blocks=[],
    )
    for i in range(depth):
        bk = jax.random.split(keys[8 + i], 10)
        params["blocks"].append(dict(
            ln1_g=jnp.ones((e,), jnp.float32),
            ln1_b=nrm(bk[0], (e,), 0.02),
            qkv_w=nrm(bk[1], (e, 3 * e), 0.02),
            qkv_b=nrm(bk[2], (3 * e,), 0.02),
            proj_w=nrm(bk[3], (e, e), 0.02),
            proj_b=nrm(bk[4], (e,), 0.02),
            ln2_g=jnp.ones((e,), jnp.float32),
            ln2_b=nrm(bk[5], (e,), 0.02),
            fc1_w=nrm(bk[6], (e, hidden), 0.02),
            fc1_b=nrm(bk[7], (hidden,), 0.02),
            fc2_w=nrm(bk[8], (hidden, e), 0.02),
            fc2_b=nrm(bk[9], (e,), 0.02),
        ))
    return params


# ----------------------------------------------------------------------------
# Demo / self-test
# ----------------------------------------------------------------------------

if __name__ == "__main__":
    cfg = dict(img_size=15, patch_size=1, in_c=30, embed_dim=64, depth=2,
               num_heads=4, mlp_ratio=4.0, num_classes=16)

    key = jax.random.PRNGKey(0)
    k_x, k_p = jax.random.split(key)
    x = jax.random.normal(k_x, (2, cfg["in_c"], cfg["img_size"], cfg["img_size"]),
                          dtype=jnp.float32)
    params = init_vit_params(k_p, cfg)

    # f32 path: exact parity with the module semantics.
    pp32 = prepare_params(params, cfg, compute_dtype=None)
    logits = jax.block_until_ready(vit_forward_pallas(pp32, x, cfg, compute_dtype=None))
    ref = vit_forward_ref(params, x, cfg, compute_dtype=None)
    assert logits.shape == (2, cfg["num_classes"]), logits.shape
    assert jnp.allclose(logits, ref, atol=5e-3, rtol=5e-3), \
        float(jnp.max(jnp.abs(logits - ref)))

    # bf16 MXU path: weights stored bf16, f32 accumulation, f32 residual stream — checked against
    # a bf16-mirroring pure-JAX reference.
    ppbf = prepare_params(params, cfg, compute_dtype=jnp.bfloat16)
    logits_bf = jax.block_until_ready(
        vit_forward_pallas(ppbf, x, cfg, compute_dtype=jnp.bfloat16))
    ref_bf = vit_forward_ref(params, x, cfg, compute_dtype=jnp.bfloat16)
    assert logits_bf.shape == (2, cfg["num_classes"]), logits_bf.shape
    assert jnp.allclose(logits_bf, ref_bf, atol=3e-2, rtol=3e-2), \
        float(jnp.max(jnp.abs(logits_bf - ref_bf)))

    print("KERNEL_OK")
</pallas_src>

<mosaic_0001>
module attributes {stable_mosaic.version = 11 : i64} {
  func.func @_linear_kernel(%arg0: i32, %arg1: memref<256x128xf32, #tpu.memory_space<vmem>>, %arg2: memref<128x128xf32, #tpu.memory_space<vmem>>, %arg3: memref<1x128xf32, #tpu.memory_space<vmem>>, %arg4: memref<256x128xf32, #tpu.memory_space<vmem>>) attributes {dimension_semantics = [#tpu.dimension_semantics<parallel>], iteration_bounds = array<i64: 2>, scalar_prefetch = 0 : i64, scratch_operands = 0 : i64, tpu.core_type = #tpu.core_type<tc>, window_params = [{transform_indices = @transform_0, window_bounds = array<i64: 256, 128>}, {pipeline_mode = #tpu.pipeline_mode<synchronous>, transform_indices = @transform_1, window_bounds = array<i64: 128, 128>}, {pipeline_mode = #tpu.pipeline_mode<synchronous>, transform_indices = @transform_2, window_bounds = array<i64: 1, 128>}, {transform_indices = @transform_3, window_bounds = array<i64: 256, 128>}]} {
    %c0 = arith.constant 0 : index
    %c0_0 = arith.constant 0 : index
    %0 = vector.load %arg1[%c0, %c0_0] : memref<256x128xf32, #tpu.memory_space<vmem>>, vector<256x128xf32>
    %c0_1 = arith.constant 0 : index
    %c0_2 = arith.constant 0 : index
    %1 = vector.load %arg2[%c0_1, %c0_2] : memref<128x128xf32, #tpu.memory_space<vmem>>, vector<128x128xf32>
    %cst = arith.constant dense<0.000000e+00> : vector<256x128xf32>
    %2 = tpu.matmul %0, %1, %cst {dimension_numbers = #tpu.dot_dimension_numbers<[1], [0], [0], [1], [0, 0, 1, 1], [], []>, precision = #tpu.contract_precision<fp32>} : vector<256x128xf32>, vector<128x128xf32>, vector<256x128xf32> -> vector<256x128xf32>
    %c0_3 = arith.constant 0 : index
    %c0_4 = arith.constant 0 : index
    %3 = vector.load %arg3[%c0_3, %c0_4] : memref<1x128xf32, #tpu.memory_space<vmem>>, vector<1x128xf32>
    %4 = vector.broadcast %3 : vector<1x128xf32> to vector<256x128xf32>
    %5 = arith.addf %2, %4 : vector<256x128xf32>
    %c0_5 = arith.constant 0 : index
    %c0_6 = arith.constant 0 : index
    %6 = vector.load %arg4[%c0_5, %c0_6] : memref<256x128xf32, #tpu.memory_space<vmem>>, vector<256x128xf32>
    tpu.vector_store %arg4[%c0_5, %c0_6], %5 {strides = array<i32>} : memref<256x128xf32, #tpu.memory_space<vmem>>, vector<256x128xf32>,
    return
  }
  func.func @transform_0(%arg0: i32) -> (i32, i32) {
    %c0_i32 = arith.constant 0 : i32
    %c0_i32_0 = arith.constant 0 : i32
    return %arg0, %c0_i32 : i32, i32
  }
  func.func @transform_1(%arg0: i32) -> (i32, i32) {
    %c0_i32 = arith.constant 0 : i32
    %c0_i32_0 = arith.constant 0 : i32
    %c0_i32_1 = arith.constant 0 : i32
    return %c0_i32, %c0_i32_0 : i32, i32
  }
  func.func @transform_2(%arg0: i32) -> (i32, i32) {
    %c0_i32 = arith.constant 0 : i32
    %c0_i32_0 = arith.constant 0 : i32
    %c0_i32_1 = arith.constant 0 : i32
    return %c0_i32, %c0_i32_0 : i32, i32
  }
  func.func @transform_3(%arg0: i32) -> (i32, i32) {
    %c0_i32 = arith.constant 0 : i32
    %c0_i32_0 = arith.constant 0 : i32
    return %arg0, %c0_i32 : i32, i32
  }
}

</mosaic_0001>

<bundles_post_ra>
// kernel: tpu_custom_call.1
= control target key start
LH: loop header
LB: loop body
LE: loop exit
PB: predicated region body
PF: predicated region fallthrough
CT: control target
= control target key end

     0   :  { %8 = vsyncpa [#allocation3], 0  ;;  %s4835_s0 = inlined_call_operand.hbm [shape: f32[512,128], index: 0, kind: input, shape index: {}]   ;;  %s4836_s1 = inlined_call_operand.hbm [shape: f32[128,128], index: 1, kind: input, shape index: {}]   ;;  %s4837_s2 = inlined_call_operand.vmem [shape: f32[1,128], index: 2, kind: input, shape index: {}]   ;;  %s4838_s3 = inlined_call_operand.hbm [shape: f32[512,128], index: 3, kind: output, shape index: {}]  }
   0x1   :  { %10 = vsyncpa [#allocation3 + $0x1], 0 }
   0x2   :  { %11 = vsyncpa [#allocation6], 0 }
   0x3   :  { %12 = vsyncpa [#allocation4], 0 }
   0x4   :  { %14 = vsyncpa [#allocation4 + $0x1], 0  ;;  %s3753_s12 = smov 0   ;;  %s3755_s13 = smov 0  }
   0x5   :  { %s3757_s14 = smov 0   ;;  %s3759_s15 = smov 0  }
   0x6 LB: > { %s3774_s16 = sadd.s32 4294967295, %s3724_s15   ;;  %s2364_s17 = sadd.s32 4294967294, %s3724_s15   ;;  %s3724_s15 = sphi %s3759_s15, %s5044_s15   ;;  %s3720_s14 = sphi %s3757_s14, %s5043_s14   ;;  %s3716_s13 = sphi %s3755_s13, %s5042_s13   ;;  %s3712_s12 = sphi %s3753_s12, %s5041_s12  }
   0x7   : > { %p40_p0 = scmp.ne.s32.totalorder %s3716_s13, %s3712_s12  ;;  %p4839_p1 = scmp.eq.s32.totalorder %s3774_s16, 0 }
   0x8   : > { %p112_p3 = scmp.eq.s32.totalorder %s2364_s17, 1  ;;  %p2365_p5 = scmp.ge.s32.totalorder %s3724_s15, 1 }
   0x9   : > { %p3783_p4 = por %p4839_p1, %p40_p0  ;;  %p119_p7 = scmp.lt.s32.totalorder %s3724_s15, 3 }
   0xa   : > { %p3788_p6 = por %p112_p3, %p40_p0  ;;  %s3726_s21 = smov [#allocation5]  }
   0xb   : > { %s4907_s18 = scalar_select %p3783_p4, 1, 0 }
   0xc   : > { %s4908_s19 = scalar_select %p3788_p6, 1, 0 }
   0xd   : > { %p3793_p8 = pnand %p2365_p5, %p119_p7  ;;  %s131_s22 = sshll.u32 %s3726_s21, 4  ;;  %s3797_s22 = int_to_ptr.vmem [resolvable:$true] %s131_s22 }
   0xe   : > { %s3809_s24 = sadd.s32 1, %s3724_s15   ;;  %s27_s25 = sadd.s32 1, %s3720_s14 }
   0xf   : > { %s4909_s20 = scalar_select %p3793_p8, 1, 0 }
  0x10   : > { %p3543_p9 = pneg %p3793_p8  ;;  %s24_s26 = ssub.s32 %s3724_s15, %s3809_s24 }
  0x11   : > { %s3596_s29 = scalar_lea.hbm %s4836_s1, 2048 }
  0x12   : > { %p3804_p11 = pnand %p3543_p9, %p4839_p1  ;;  %p3597_p12 = scmp.ne.s32.totalorder %s4836_s1, %s3596_s29 }
  0x13   : > { %p3603_p5 = scmp.lt.u32.totalorder %s3596_s29, %s4836_s1 }
  0x14   : > { %p3598_p13 = pneg %p3804_p11 }
  0x16   : > { %p3599_p0 = pnand %p3598_p13, %p3597_p12 }
  0x18   : > { %p3600_p3 = pneg %p3599_p0 }
  0x1a   : > { %p3605_p7 = pnand %p3603_p5, %p3600_p3 }
  0x1c   : > { %3608 = shalt.err (!%p3605_p7)
}
  0x1d   : > { %s3609_s7 = scalar_lea.vmem %s3797_s22, 2048  ;;  %p3617_p2 = scmp.lt.s32.totalorder %s3797_s22, %s3797_s22 }
  0x1e   : > { %p3610_p9 = scmp.ne.s32.totalorder %s3797_s22, %s3609_s7  ;;  %p3618_p6 = scmp.lt.s32.totalorder %s3609_s7, %s3609_s7 }
  0x20   : > { %p3612_p10 = pnand %p3610_p9, %p3598_p13  ;;  %p3619_p4 = por %p3618_p6, %p3617_p2 }
  0x22   : > { %p3613_p1 = pneg %p3612_p10 }
  0x24   : > { %p3620_p8 = pnand %p3619_p4, %p3613_p1 }
  0x26   : > { %3623 = shalt.err (!%p3620_p8)
}
  0x27   : > { %s3727_s8 = smov 128   ;;  %s3728_s9 = smov 8  }
  0x28   : > { %3546 = dma.hbm_to_vmem [thread:$0]  (!%p3804_p11), %s4836_s1, 2048, %s3797_s22, [#allocation6], %s3727_s8, %s3727_s8, %s3728_s9  }
  0x29   : > { %p25_p1 = scmp.eq.s32.totalorder %s24_s26, 0  ;;  %p34_p2 = scmp.ne.s32.totalorder %s3720_s14, %s3716_s13 }
  0x2a   : > { %p35_p4 = scmp.eq.s32.totalorder %s3724_s15, 0  ;;  %p3556_p6 = scmp.lt.s32.totalorder %s3724_s15, 2 }
  0x2b   : > { %s3843_s17 = scalar_select %p25_p1, %s3720_s14, %s27_s25  }
  0x2c   : > { %p36_p8 = por %p35_p4, %p34_p2  ;;  %p4911_p10 = scmp.eq.s32.totalorder %s3774_s16, 1 }
  0x2d   : > { %s148_s23 = sand.u32 1, %s3720_s14   ;;  %s2381_s27 = sshll.u32 %s3724_s15, 12 }
  0x2e   : > { %p3847_p12 = por %p4911_p10, %p34_p2  ;;  %s2368_s28 = sshll.u32 %s148_s23, 8 }
  0x2f   : > { %s3856_s4 = scalar_lea.hbm %s4835_s0, %s2381_s27  ;;  %s152_s22 = scalar_lea.vmem [#allocation2], %s2368_s28 }
  0x30   : > { %s159_s25 = sshll.u32 %s152_s22, 4  ;;  %p3858_p11 = pnand %p3556_p6, %p36_p8  ;;  %s3862_s25 = int_to_ptr.vmem [resolvable:$true] %s159_s25 }
  0x31   : > { %s3864_s5 = scalar_lea.sflag [#allocation3], %s148_s23  ;;  %s3624_s6 = scalar_lea.hbm %s3856_s4, 4096 }
  0x32   : > { %p3625_p13 = scmp.ne.s32.totalorder %s3856_s4, %s3624_s6  ;;  %p3626_p0 = pneg %p3858_p11 }
  0x33   : > { %s3629_s11 = scalar_lea.hbm %s4835_s0, 8192  ;;  %p3630_p7 = scmp.lt.u32.totalorder %s3856_s4, %s4835_s0 }
  0x34   : > { %p3627_p3 = pnand %p3626_p0, %p3625_p13  ;;  %p3631_p9 = scmp.lt.u32.totalorder %s3629_s11, %s3624_s6 }
  0x35   : > { %p3633_p2 = scmp.lt.u32.totalorder %s3624_s6, %s3856_s4 }
  0x36   : > { %p3628_p5 = pneg %p3627_p3  ;;  %p3632_p1 = por %p3631_p9, %p3630_p7 }
  0x38   : > { %p3634_p4 = por %p3633_p2, %p3632_p1 }
  0x3a   : > { %p3635_p6 = pnand %p3634_p4, %p3628_p5 }
  0x3c   : > { %3638 = shalt.err (!%p3635_p6)
}
  0x3d   : > { %s3639_s23 = scalar_lea.vmem %s3862_s25, 4096  ;;  %s3729_s29 = smov [#allocation2]  }
  0x3e   : > { %p3640_p8 = scmp.ne.s32.totalorder %s3862_s25, %s3639_s23  ;;  %s3644_s30 = sshll.u32 %s3729_s29, 4  ;;  %s3645_s30 = int_to_ptr.vmem [resolvable:$false] %s3644_s30 }
  0x3f   : > { %s3646_s22 = scalar_lea.vmem %s3645_s30, 8192  ;;  %p3647_p3 = scmp.lt.s32.totalorder %s3862_s25, %s3645_s30 }
  0x40   : > { %p3642_p10 = pnand %p3640_p8, %p3626_p0  ;;  %p3648_p7 = scmp.lt.s32.totalorder %s3646_s22, %s3639_s23 }
  0x42   : > { %p3643_p13 = pneg %p3642_p10  ;;  %p3649_p9 = por %p3648_p7, %p3647_p3 }
  0x44   : > { %p3650_p1 = pnand %p3649_p9, %p3643_p13 }
  0x46   : > { %3653 = shalt.err (!%p3650_p1)
}
  0x47   : > { %3550 = dma.hbm_to_vmem [thread:$0]  (!%p3858_p11), %s3856_s4, 4096, %s3862_s25, %s3864_s5, %s3727_s8, %s3727_s8, %s3728_s9  }
  0x48   : > { %p4914_p0 = scmp.ne.s32.totalorder %s4909_s20, 0 }
  0x4a   : > { %171 = sbr.rel (%p4914_p0) target bundleno = 548 (0x224), region = 32 }
  0x51   : > { %s3898_s6 = sand.u32 1, %s3716_s13   ;;  %p4915_p5 = scmp.ne.s32.totalorder %s4907_s18, 0 }
  0x52   : > { %s2372_s7 = sshll.u32 %s3898_s6, 8  ;;  %s174_s10 = scalar_lea.sflag [#allocation3], %s3898_s6 }
  0x53   : > { %s3904_s26 = scalar_lea.vmem [#allocation2], %s2372_s7 }
  0x54   : > { %3699 = dma.done.wait (%p4915_p5), %s174_s10, 4096  }
  0x55   : > { %3701 = vsyncadd (%p4915_p5), %s174_s10, 4294963200  ;;  %p4916_p11 = scmp.eq.s32.totalorder %s3774_s16, 0 }
  0x57   : > { %3703 = dma.done.wait (%p4916_p11), [#allocation6], 2048   ;;  %p4917_p2 = pmov %p4916_p11 }
  0x58   : > { %v238_v0 = vld [vmem:[#allocation5] sm:$0xff]  ;;  %v239_v1 = vld [vmem:[#allocation5 + $0x8] sm:$0xff]  ;;  %v3914_v2 = vld [vmem:[#allocation5 + $0x10] sm:$0xff]  ;;  %s4720_s8 = scalar_lea.vmem [#allocation7], %s2372_s7  ;;  %s2382_s9 = sshll.u32 %s3774_s16, 12 }
  0x59   : > { %3705 = vsyncadd (%p4917_p2), [#allocation6], 4294965248  ;;  %v262_v3 = vand.u32 4294901760, %v238_v0  ;;  %v265_v4 = vand.u32 4294901760, %v239_v1  ;;  %v3916_v5 = vld [vmem:[#allocation5 + $0x18] sm:$0xff]  ;;  %v268_v6 = vand.u32 4294901760, %v3914_v2  ;;  %s4787_s11 = scalar_lea.hbm %s4838_s3, %s2382_s9 }
  0x5a   : > { %v3919_v7 = vld [vmem:[#allocation5 + $0x20] sm:$0xff]  ;;  %v3921_v8 = vld [vmem:[#allocation5 + $0x28] sm:$0xff]  ;;  %v271_v9 = vand.u32 4294901760, %v3916_v5  ;;  %v3934_v14 = vld [vmem:[#allocation5 + $0x30] sm:$0xff]  ;;  %s2281_s4 = sshll.u32 %s4720_s8, 4  ;;  %s2268_s16 = scalar_lea.sflag [#allocation4], %s3898_s6  ;;  %s4789_s4 = int_to_ptr.vmem [resolvable:$true] %s2281_s4 }
  0x5b   : > { %v3924_v10 = vpack.c.bf16 %v265_v4, %v262_v3  ;;  %v274_v11 = vand.u32 4294901760, %v3919_v7  ;;  %v277_v12 = vand.u32 4294901760, %v3921_v8  ;;  %v3936_v15 = vld [vmem:[#allocation5 + $0x38] sm:$0xff]  ;;  %v206_v16 = vld [vmem:[%s3904_s26] sm:$0xff]  ;;  %v280_v19 = vand.u32 4294901760, %v3934_v14  ;;  %v3957_v22 = vld [vmem:[#allocation5 + $0x48] sm:$0xff] }
  0x5c   : > { %v3932_v13 = vpack.c.bf16 %v271_v9, %v268_v6  ;;  %v3943_v17 = vand.u32 4294901760, %v206_v16  ;;  %v283_v20 = vand.u32 4294901760, %v3936_v15  ;;  %v3955_v21 = vld [vmem:[#allocation5 + $0x40] sm:$0xff]  ;;  %v207_v25 = vld [vmem:[%s3904_s26 + $0x8] sm:$0xff]  ;;  %v4849_v28 = vand.u32 4294901760, %v3957_v22  ;;  %v3976_v29 = vld [vmem:[#allocation5 + $0x50] sm:$0xff] }
  0x5d   : > { %3152 = vmatprep.subr.bf16.mxu1 %v3924_v10  ;;  %3248 = vmatprep.subr.bf16.mxu0 %v3924_v10  ;;  %v3951_v18 = vpack.c.bf16 %v277_v12, %v274_v11  ;;  %v4850_v27 = vand.u32 4294901760, %v3955_v21  ;;  %v3978_v30 = vld [vmem:[#allocation5 + $0x58] sm:$0xff]  ;;  %v208_v32 = vld [vmem:[%s3904_s26 + $0x10] sm:$0xff]  ;;  %v3982_v33 = vand.u32 4294901760, %v207_v25  ;;  %v4847_v35 = vand.u32 4294901760, %v3976_v29  ;;  %v3989_v37 = vld [vmem:[#allocation5 + $0x60] sm:$0xff] }
  0x5e   : > { %3154 = vmatpush3.bf16.msra.mxu1 %v3924_v10  ;;  %3250 = vmatpush3.bf16.msra.mxu0 %v3924_v10  ;;  %v3960_v23 = vsub.f32 %v206_v16, %v3943_v17  ;;  %v3972_v26 = vpack.c.bf16 %v283_v20, %v280_v19  ;;  %v209_v34 = vld [vmem:[%s3904_s26 + $0x18] sm:$0xff]  ;;  %v4846_v36 = vand.u32 4294901760, %v3978_v30  ;;  %v3991_v39 = vsub.f32 %v238_v0, %v262_v3  ;;  %v4001_v41 = vld [vmem:[#allocation5 + $0x68] sm:$0xff]  ;;  %v210_v44 = vld [vmem:[%s3904_s26 + $0x20] sm:$0xff]  ;;  %s3654_s27 = scalar_lea.vmem %s4789_s4, 4096  ;;  %s3730_s28 = smov [#allocation7]  }
  0x5f   : > { %3156 = vmatprep.subr.bf16.mxu1 %v3932_v13  ;;  %3252 = vmatprep.subr.bf16.mxu0 %v3932_v13  ;;  %v3999_v40 = vpack.c.bf16 %v4849_v28, %v4850_v27  ;;  %v4003_v42 = vsub.f32 %v239_v1, %v265_v4  ;;  %v4005_v43 = vand.u32 4294901760, %v208_v32  ;;  %v4008_v45 = vand.u32 4294901760, %v209_v34  ;;  %v4011_v47 = vld [vmem:[#allocation5 + $0x70] sm:$0xff]  ;;  %v4013_v48 = vld [vmem:[#allocation5 + $0x78] sm:$0xff]  ;;  %v211_v56 = vld [vmem:[%s3904_s26 + $0x28] sm:$0xff]  ;;  %p3655_p4 = scmp.ne.s32.totalorder %s4789_s4, %s3654_s27  ;;  %s3658_s23 = sshll.u32 %s3730_s28, 4  ;;  %s3659_s23 = int_to_ptr.vmem [resolvable:$false] %s3658_s23 }
  0x60   : > { %4918 = vst [vmem:[#allocation11_spill] sm:$0xff] %v3960_v23  ;;  %v344_v24 = vand.u32 4294901760, %v3960_v23  ;;  %4919 = vst [vmem:[#allocation12_spill] sm:$0xff] %v3972_v26  ;;  %v4845_v46 = vand.u32 4294901760, %v3989_v37  ;;  %v4016_v49 = vsub.f32 %v207_v25, %v3982_v33  ;;  %v4024_v50 = vpack.c.bf16 %v4846_v36, %v4847_v35  ;;  %v212_v3 = vld [vmem:[%s3904_s26 + $0x30] sm:$0xff]  ;;  %v213_v4 = vld [vmem:[%s3904_s26 + $0x38] sm:$0xff]  ;;  %p3661_p10 = scmp.lt.s32.totalorder %s4789_s4, %s3659_s23 }
  0x61   : > { %4920 = vst [vmem:[#allocation13_spill] sm:$0xff] %v3999_v40  ;;  %v4844_v51 = vand.u32 4294901760, %v4001_v41  ;;  %v665_v52 = vand.u32 4294901760, %v3991_v39  ;;  %v4028_v53 = vand.u32 4294901760, %v210_v44  ;;  %v672_v54 = vand.u32 4294901760, %v4003_v42  ;;  %p3656_p6 = pnand %p3655_p4, %p3847_p12  ;;  %s3660_s29 = scalar_lea.vmem %s3659_s23, 8192 }
  0x62   : > { %3158 = vmatpush3.bf16.msra.mxu1 %v3932_v13  ;;  %3254 = vmatpush3.bf16.msra.mxu0 %v3932_v13  ;;  %v345_v31 = vsub.f32 %v3960_v23, %v344_v24  ;;  %4921 = vst [vmem:[#allocation14_spill] sm:$0xff] %v4016_v49  ;;  %4922 = vst [vmem:[#allocation15_spill] sm:$0xff] %v4024_v50  ;;  %v4034_v55 = vsub.f32 %v208_v32, %v4005_v43  ;;  %v4843_v59 = vand.u32 4294901760, %v4011_v47  ;;  %p3662_p13 = scmp.lt.s32.totalorder %s3660_s29, %s3654_s27 }
  0x63   : > { %3160 = vmatprep.subr.bf16.mxu1 %v3951_v18  ;;  %3256 = vmatprep.subr.bf16.mxu0 %v3951_v18  ;;  %v4040_v57 = vsub.f32 %v3914_v2, %v268_v6  ;;  %v4045_v58 = vsub.f32 %v3916_v5, %v271_v9  ;;  %v4842_v60 = vand.u32 4294901760, %v4013_v48  ;;  %v4050_v61 = vsub.f32 %v209_v34, %v4008_v45  ;;  %p3657_p8 = pneg %p3656_p6 }
  0x64   : > { %2943 = vmatprep.mubr.f32.mxu0 %v344_v24  ;;  %v346_v38 = vand.u32 4294901760, %v345_v31  ;;  %4923 = vst [vmem:[#allocation16_spill] sm:$0xff] %v4034_v55  ;;  %v4852_v62 = vand.u32 4294901760, %v4016_v49  ;;  %v4059_v63 = vpack.c.bf16 %v4844_v51, %v4845_v46  ;;  %v666_v0 = vsub.f32 %v3991_v39, %v665_v52  ;;  %v214_v24 = vld [vmem:[%s3904_s26 + $0x40] sm:$0xff]  ;;  %v215_v51 = vld [vmem:[%s3904_s26 + $0x48] sm:$0xff]  ;;  %p3663_p3 = por %p3662_p13, %p3661_p10 }
  0x65   : > { %4924 = vst [vmem:[#allocation17_spill] sm:$0xff] %v4050_v61  ;;  %v4063_v1 = vsub.f32 %v210_v44, %v4028_v53  ;;  %v4065_v2 = vand.u32 4294901760, %v211_v56  ;;  %v673_v5 = vsub.f32 %v4003_v42, %v672_v54  ;;  %v4848_v6 = vand.u32 4294901760, %v4034_v55 }
  0x66   : > { %3162 = vmatpush3.bf16.msra.mxu1 %v3951_v18  ;;  %3258 = vmatpush3.bf16.msra.mxu0 %v3951_v18  ;;  %4925 = vst [vmem:[#allocation18_spill] sm:$0xff] %v4059_v63  ;;  %v4854_v9 = vand.u32 4294901760, %v4040_v57  ;;  %v4853_v16 = vand.u32 4294901760, %v4045_v58  ;;  %v4080_v25 = vpack.c.bf16 %v4842_v60, %v4843_v59  ;;  %v4851_v31 = vand.u32 4294901760, %v4050_v61  ;;  %p3664_p7 = pnand %p3663_p3, %p3657_p8 }
  0x67   : > { %3164 = vmatprep.subr.bf16.mxu1 %v3972_v26  ;;  %3260 = vmatprep.subr.bf16.mxu0 %v3972_v26  ;;  %4926 = vst [vmem:[#allocation19_spill] sm:$0xff] %v4063_v1  ;;  %4927 = vst [vmem:[#allocation20_spill] sm:$0xff] %v4065_v2  ;;  %v4086_v32 = vsub.f32 %v3919_v7, %v274_v11  ;;  %v4091_v34 = vsub.f32 %v3921_v8, %v277_v12  ;;  %v4100_v60 = vand.u32 4294901760, %v212_v3 }
  0x68   : > { %2703 = vmatprep.mubr.f32.mxu1 %v346_v38  ;;  %4928 = vst [vmem:[#allocation21_spill] sm:$0xff] %v4080_v25  ;;  %v4096_v38 = vsub.f32 %v4016_v49, %v4852_v62  ;;  %v4098_v44 = vpack.c.bf16 %v672_v54, %v665_v52  ;;  %v4102_v59 = vand.u32 4294901760, %v213_v4  ;;  %v667_v7 = vand.u32 4294901760, %v666_v0 }
  0x69   : > { %4929 = vst [vmem:[#allocation22_spill] sm:$0xff] %v4100_v60  ;;  %v4856_v11 = vand.u32 4294901760, %v4063_v1  ;;  %v4108_v8 = vsub.f32 %v211_v56, %v4065_v2  ;;  %v4110_v12 = vand.u32 4294901760, %v214_v24  ;;  %v674_v52 = vand.u32 4294901760, %v673_v5 }
  0x6a   : > { %3166 = vmatpush3.bf16.msra.mxu1 %v3972_v26  ;;  %3262 = vmatpush3.bf16.msra.mxu0 %v3972_v26  ;;  %4930 = vst [vmem:[#allocation23_spill] sm:$0xff] %v4102_v59  ;;  %v365_v54 = vsub.f32 %v4034_v55, %v4848_v6  ;;  %v680_v0 = vsub.f32 %v4040_v57, %v4854_v9  ;;  %v693_v36 = vand.u32 4294901760, %v4086_v32  ;;  %v700_v5 = vand.u32 4294901760, %v4091_v34  ;;  %v216_v9 = vld [vmem:[%s3904_s26 + $0x50] sm:$0xff] }
  0x6b   : > { %3168 = vmatprep.subr.bf16.mxu1 %v3999_v40  ;;  %3264 = vmatprep.subr.bf16.mxu0 %v3999_v40  ;;  %4931 = vst [vmem:[#allocation24_spill] sm:$0xff] %v4108_v8  ;;  %4932 = vst [vmem:[#allocation25_spill] sm:$0xff] %v4110_v12  ;;  %v687_v56 = vsub.f32 %v4045_v58, %v4853_v16  ;;  %v4127_v46 = vsub.f32 %v4050_v61, %v4851_v31  ;;  %v4142_v27 = vand.u32 4294901760, %v215_v51 }
  0x6c   : > { %v4134_v35 = vsub.f32 %v3934_v14, %v280_v19  ;;  %v4137_v6 = vsub.f32 %v212_v3, %v4100_v60  ;;  %v4140_v28 = vsub.f32 %v213_v4, %v4102_v59  ;;  %v4147_v31 = vsub.f32 %v3936_v15, %v283_v20 }
  0x6d   : > { %4935 = vst [vmem:[#allocation28_spill] sm:$0xff] %v4142_v27  ;;  %v356_v14 = vand.u32 4294901760, %v4096_v38  ;;  %v4155_v19 = vsub.f32 %v4063_v1, %v4856_v11  ;;  %v4159_v4 = vsub.f32 %v214_v24, %v4110_v12  ;;  %v3183_v15 = vpack.c.bf16 %v674_v52, %v667_v7  ;;  %v217_v11 = vld [vmem:[%s3904_s26 + $0x58] sm:$0xff] }
  0x6e   : > { %3170 = vmatpush3.bf16.msra.mxu1 %v3999_v40  ;;  %3266 = vmatpush3.bf16.msra.mxu0 %v3999_v40  ;;  %4933 = vst [vmem:[#allocation26_spill] sm:$0xff] %v4137_v6  ;;  %4934 = vst [vmem:[#allocation27_spill] sm:$0xff] %v4140_v28  ;;  %v366_v20 = vand.u32 4294901760, %v365_v54  ;;  %v681_v62 = vand.u32 4294901760, %v680_v0  ;;  %v688_v16 = vand.u32 4294901760, %v687_v56  ;;  %v694_v38 = vsub.f32 %v4086_v32, %v693_v36 }
  0x6f   : > { %3172 = vmatprep.subr.bf16.mxu1 %v4024_v50  ;;  %3268 = vmatprep.subr.bf16.mxu0 %v4024_v50  ;;  %4936 = vst [vmem:[#allocation29_spill] sm:$0xff] %v4159_v4  ;;  %v701_v23 = vsub.f32 %v4091_v34, %v700_v5  ;;  %v4174_v52 = vsub.f32 %v215_v51, %v4142_v27  ;;  %v386_v54 = vand.u32 4294901760, %v4155_v19  ;;  %v4938_v0 = vand.u32 4294901760, %v4108_v8  ;;  %v219_v27 = vld [vmem:[%s3904_s26 + $0x68] sm:$0xff] }
  0x70   : > { %v4185_v24 = vand.u32 4294901760, %v216_v9  ;;  %v3187_v51 = vpack.c.bf16 %v688_v16, %v681_v62  ;;  %v4939_v7 = vand.u32 4294901760, %v4040_v57  ;;  %v4940_v40 = vand.u32 4294901760, %v4045_v58 }
  0x71   : > { %4937 = vst [vmem:[#allocation30_spill] sm:$0xff] %v4174_v52  ;;  %v4182_v56 = vsub.f32 %v4108_v8, %v4938_v0  ;;  %v695_v0 = vand.u32 4294901760, %v694_v38  ;;  %v702_v12 = vand.u32 4294901760, %v701_v23  ;;  %v4943_v26 = vand.u32 4294901760, %v4147_v31 }
  0x72   : > { %3174 = vmatpush3.bf16.msra.mxu1 %v4024_v50  ;;  %3270 = vmatpush3.bf16.msra.mxu0 %v4024_v50  ;;  %v376_v50 = vand.u32 4294901760, %v4127_v46  ;;  %v3283_v3 = vpack.c.bf16 %v4940_v40, %v4939_v7  ;;  %v4942_v46 = vand.u32 4294901760, %v4134_v35  ;;  %v4944_v16 = vand.u32 4294901760, %v4016_v49 }
  0x73   : > { %3176 = vmatprep.subr.bf16.mxu1 %v4059_v63  ;;  %3272 = vmatprep.subr.bf16.mxu0 %v4059_v63  ;;  %v715_v62 = vsub.f32 %v4147_v31, %v4943_v26  ;;  %v4945_v40 = vand.u32 4294901760, %v4137_v6  ;;  %v4946_v60 = vand.u32 4294901760, %v4140_v28  ;;  %v4948_v26 = vand.u32 4294901760, %v4159_v4 }
  0x74   : > { %v708_v59 = vsub.f32 %v4134_v35, %v4942_v46  ;;  %v4947_v46 = vand.u32 4294901760, %v3955_v21  ;;  %v4951_v38 = vand.u32 4294901760, %v3957_v22 }
  0x75   : > { %v405_v7 = vsub.f32 %v4137_v6, %v4945_v40  ;;  %v4211_v23 = vsub.f32 %v4140_v28, %v4946_v60  ;;  %v4227_v40 = vand.u32 4294901760, %v219_v27  ;;  %v220_v60 = vld [vmem:[%s3904_s26 + $0x70] sm:$0xff] }
  0x76   : > { %3178 = vmatpush3.bf16.msra.mxu1 %v4059_v63  ;;  %3274 = vmatpush3.bf16.msra.mxu0 %v4059_v63  ;;  %v218_v63 = vld [vmem:[%s3904_s26 + $0x60] sm:$0xff]  ;;  %v4217_v2 = vsub.f32 %v3955_v21, %v4947_v46  ;;  %v4233_v49 = vsub.f32 %v3957_v22, %v4951_v38  ;;  %v4952_v21 = vand.u32 4294901760, %v4034_v55  ;;  %v709_v22 = vand.u32 4294901760, %v708_v59 }
  0x77   : > { %3180 = vmatprep.subr.bf16.mxu1 %v4080_v25  ;;  %3276 = vmatprep.subr.bf16.mxu0 %v4080_v25  ;;  %v4194_v19 = vand.u32 4294901760, %v218_v63  ;;  %4950 = vst [vmem:[#allocation33_spill] sm:$0xff] %v4227_v40  ;;  %v716_v38 = vand.u32 4294901760, %v715_v62  ;;  %v4958_v59 = vand.u32 4294901760, %v4174_v52  ;;  %v221_v62 = vld [vmem:[%s3904_s26 + $0x78] sm:$0xff] }
  0x78   : > { %v721_v46 = vand.u32 4294901760, %v4217_v2  ;;  %v728_v55 = vand.u32 4294901760, %v4233_v49 }
  0x79   : > { %4941 = vst [vmem:[#allocation31_spill] sm:$0xff] %v4194_v19 }
  0x7a   : > { %3182 = vmatpush3.bf16.msra.mxu1 %v4080_v25  ;;  %3278 = vmatpush3.bf16.msra.mxu0 %v4080_v25  ;;  %v4192_v25 = vand.u32 4294901760, %v217_v11 }
  0x7b   : > { %3184 = vmatprep.subr.bf16.mxu1 %v3183_v15  ;;  %3280 = vmatprep.subr.bf16.mxu0 %v4098_v44 }
  0x7d   : > { %2704 = vmatmul.mubr.f32.vlgmr.msra.gmra.mrb[0].mxu1 %v356_v14  ;;  %2944 = vmatmul.mubr.f32.vlgmr.msra.gmra.mrb[0].mxu0 %v4944_v16  ;;  %v4222_v14 = vsub.f32 %v4159_v4, %v4948_v26  ;;  %v4225_v16 = vsub.f32 %v216_v9, %v4185_v24  ;;  %v4242_v9 = vsub.f32 %v218_v63, %v4194_v19  ;;  %v4249_v63 = vand.u32 4294901760, %v220_v60 }
  0x7e   : > { %3186 = vmatpush3.bf16.msra.mxu1 %v3183_v15  ;;  %2706 = vmatprep.mubr.f32.mxu1 %v366_v20  ;;  %v3287_v15 = vpack.c.bf16 %v700_v5, %v693_v36  ;;  %v4239_v20 = vsub.f32 %v217_v11, %v4192_v25  ;;  %v3191_v26 = vpack.c.bf16 %v702_v12, %v695_v0  ;;  %v396_v36 = vand.u32 4294901760, %v4182_v56 }
  0x7f   : > { %4949 = vst [vmem:[#allocation32_spill] sm:$0xff] %v4225_v16  ;;  %2946 = vmatprep.mubr.f32.mxu0 %v4952_v21  ;;  %3282 = vmatpush3.bf16.msra.mxu0 %v4098_v44  ;;  %4954 = vst [vmem:[#allocation35_spill] sm:$0xff] %v4242_v9  ;;  %v4955_v44 = vand.u32 4294901760, %v4050_v61  ;;  %v406_v11 = vand.u32 4294901760, %v405_v7  ;;  %v722_v5 = vsub.f32 %v4217_v2, %v721_v46  ;;  %v4957_v12 = vand.u32 4294901760, %v4063_v1  ;;  %v223_v1 = vld [vmem:[%s3904_s26 + $0x88] sm:$0xff] }
  0x80   : > { %4953 = vst [vmem:[#allocation34_spill] sm:$0xff] %v4239_v20  ;;  %3188 = vmatprep.subr.bf16.mxu1 %v3187_v51  ;;  %3284 = vmatprep.subr.bf16.mxu0 %v3283_v3  ;;  %4956 = vst [vmem:[#allocation36_spill] sm:$0xff] %v4249_v63  ;;  %v4261_v56 = vsub.f32 %v219_v27, %v4227_v40  ;;  %v729_v7 = vsub.f32 %v4233_v49, %v728_v55  ;;  %v426_v21 = vand.u32 4294901760, %v4222_v14 }
  0x81   : > { %2707 = vmatmul.mubr.f32.gmra.mrb[2].mxu1 %v376_v50  ;;  %2947 = vmatmul.mubr.f32.gmra.mrb[2].mxu0 %v4955_v44  ;;  %v4257_v50 = vsub.f32 %v4174_v52, %v4958_v59  ;;  %v222_v59 = vld [vmem:[%s3904_s26 + $0x80] sm:$0xff]  ;;  %v3195_v27 = vpack.c.bf16 %v716_v38, %v709_v22  ;;  %v4960_v0 = vand.u32 4294901760, %v4134_v35  ;;  %v4961_v61 = vand.u32 4294901760, %v4147_v31  ;;  %v224_v44 = vld [vmem:[%s3904_s26 + $0x90] sm:$0xff] }
  0x82   : > { %2709 = vmatprep.mubr.f32.mxu1 %v386_v54  ;;  %2949 = vmatprep.mubr.f32.mxu0 %v4957_v12  ;;  %4959 = vst [vmem:[#allocation37_spill] sm:$0xff] %v4261_v56  ;;  %v416_v54 = vand.u32 4294901760, %v4211_v23  ;;  %v730_v40 = vand.u32 4294901760, %v729_v7  ;;  %v4962_v23 = vand.u32 4294901760, %v4108_v8  ;;  %v4278_v14 = vsub.f32 %v220_v60, %v4249_v63 }
  0x83   : > { %3190 = vmatpush3.bf16.msra.mxu1 %v3187_v51  ;;  %3286 = vmatpush3.bf16.msra.mxu0 %v3283_v3  ;;  %v3291_v51 = vpack.c.bf16 %v4961_v61, %v4960_v0  ;;  %v723_v3 = vand.u32 4294901760, %v722_v5  ;;  %v4280_v12 = vand.u32 4294901760, %v221_v62  ;;  %v4963_v19 = vand.u32 4294901760, %v3976_v29 }
  0x84   : > { %3192 = vmatprep.subr.bf16.mxu1 %v3191_v26  ;;  %3288 = vmatprep.subr.bf16.mxu0 %v3287_v15  ;;  %v4964_v38 = vand.u32 4294901760, %v3978_v30  ;;  %v4966_v60 = vand.u32 4294901760, %v4225_v16  ;;  %v4299_v7 = vand.u32 4294901760, %v222_v59 }
  0x85   : > { %2710 = vmatmul.mubr.f32.gmra.mrb[4].mxu1 %v396_v36  ;;  %2950 = vmatmul.mubr.f32.gmra.mrb[4].mxu0 %v4962_v23  ;;  %v4286_v22 = vsub.f32 %v3976_v29, %v4963_v19  ;;  %v4965_v36 = vand.u32 4294901760, %v4137_v6  ;;  %v4301_v29 = vand.u32 4294901760, %v223_v1  ;;  %v436_v19 = vand.u32 4294901760, %v4257_v50 }
  0x86   : > { %v4291_v61 = vsub.f32 %v3978_v30, %v4964_v38  ;;  %2712 = vmatprep.mubr.f32.mxu1 %v406_v11  ;;  %v445_v5 = vsub.f32 %v4225_v16, %v4966_v60  ;;  %v4967_v30 = vand.u32 4294901760, %v4239_v20  ;;  %v3199_v0 = vpack.c.bf16 %v730_v40, %v723_v3 }
  0x87   : > { %2952 = vmatprep.mubr.f32.mxu0 %v4965_v36  ;;  %3194 = vmatpush3.bf16.msra.mxu1 %v3191_v26  ;;  %v735_v23 = vand.u32 4294901760, %v4286_v22  ;;  %v4968_v36 = vand.u32 4294901760, %v4242_v9  ;;  %v3295_v6 = vpack.c.bf16 %v728_v55, %v721_v46  ;;  %v4314_v50 = vand.u32 4294901760, %v224_v44 }
  0x88   : > { %3290 = vmatpush3.bf16.msra.mxu0 %v3287_v15  ;;  %v455_v11 = vsub.f32 %v4239_v20, %v4967_v30  ;;  %v742_v38 = vand.u32 4294901760, %v4291_v61  ;;  %3196 = vmatprep.subr.bf16.mxu1 %v3195_v27  ;;  %v225_v15 = vld [vmem:[%s3904_s26 + $0x98] sm:$0xff]  ;;  %v4969_v26 = vand.u32 4294901760, %v4140_v28  ;;  %v4321_v8 = vsub.f32 %v221_v62, %v4280_v12 }
  0x89   : > { %v4312_v60 = vsub.f32 %v4242_v9, %v4968_v36  ;;  %3292 = vmatprep.subr.bf16.mxu0 %v3291_v51  ;;  %2713 = vmatmul.mubr.f32.gmra.mrb[6].mxu1 %v416_v54  ;;  %v736_v36 = vsub.f32 %v4286_v22, %v735_v23  ;;  %v4970_v55 = vand.u32 4294901760, %v4159_v4  ;;  %v446_v40 = vand.u32 4294901760, %v445_v5 }
  0x8a   : > { %2953 = vmatmul.mubr.f32.gmra.mrb[6].mxu0 %v4969_v26  ;;  %v743_v63 = vsub.f32 %v4291_v61, %v742_v38  ;;  %2715 = vmatprep.mubr.f32.mxu1 %v426_v21  ;;  %v4971_v46 = vand.u32 4294901760, %v4261_v56  ;;  %v4333_v3 = vsub.f32 %v222_v59, %v4299_v7  ;;  %v4336_v62 = vsub.f32 %v223_v1, %v4301_v29  ;;  %v226_v21 = vld [vmem:[%s3904_s26 + $0xa0] sm:$0xff]  ;;  %v227_v1 = vld [vmem:[%s3904_s26 + $0xa8] sm:$0xff] }
  0x8b   : > { %2955 = vmatprep.mubr.f32.mxu0 %v4970_v55  ;;  %3198 = vmatpush3.bf16.msra.mxu1 %v3195_v27  ;;  %v4338_v26 = vand.u32 4294901760, %v225_v15  ;;  %v737_v30 = vand.u32 4294901760, %v736_v36  ;;  %v4972_v5 = vand.u32 4294901760, %v3989_v37  ;;  %v4347_v59 = vsub.f32 %v224_v44, %v4314_v50 }
  0x8c   : > { %v4330_v54 = vsub.f32 %v4261_v56, %v4971_v46  ;;  %3294 = vmatpush3.bf16.msra.mxu0 %v3291_v51  ;;  %v744_v55 = vand.u32 4294901760, %v743_v63  ;;  %v456_v46 = vand.u32 4294901760, %v455_v11  ;;  %3200 = vmatprep.subr.bf16.mxu1 %v3199_v0  ;;  %v3299_v27 = vpack.c.bf16 %v742_v38, %v735_v23 }
  0x8d   : > { %v4344_v4 = vsub.f32 %v3989_v37, %v4972_v5  ;;  %3296 = vmatprep.subr.bf16.mxu0 %v3295_v6  ;;  %v4973_v51 = vand.u32 4294901760, %v4001_v41  ;;  %2716 = vmatmul.mubr.f32.gmra.mrb[8].mxu1 %v436_v19  ;;  %v4974_v63 = vand.u32 4294901760, %v4174_v52  ;;  %v4975_v37 = vand.u32 4294901760, %v4278_v14 }
  0x8e   : > { %v3203_v5 = vpack.c.bf16 %v744_v55, %v737_v30  ;;  %2718 = vmatprep.mubr.f32.mxu1 %v446_v40  ;;  %v4976_v23 = vand.u32 4294901760, %v4225_v16  ;;  %v4366_v38 = vand.u32 4294901760, %v226_v21  ;;  %v4372_v30 = vsub.f32 %v225_v15, %v4338_v26 }
  0x8f   : > { %v4353_v28 = vsub.f32 %v4001_v41, %v4973_v51  ;;  %2956 = vmatmul.mubr.f32.gmra.mrb[8].mxu0 %v4974_v63  ;;  %v485_v11 = vsub.f32 %v4278_v14, %v4975_v37  ;;  %v749_v44 = vand.u32 4294901760, %v4344_v4  ;;  %v466_v41 = vand.u32 4294901760, %v4312_v60  ;;  %v228_v51 = vld [vmem:[%s3904_s26 + $0xb0] sm:$0xff]  ;;  %3202 = vmatpush3.bf16.msra.mxu1 %v3199_v0 }
  0x90   : > { %2958 = vmatprep.mubr.f32.mxu0 %v4976_v23  ;;  %4977 = vst [vmem:[#allocation38_spill] sm:$0xff] %v4366_v38  ;;  %3298 = vmatpush3.bf16.msra.mxu0 %v3295_v6  ;;  %v4374_v40 = vand.u32 4294901760, %v227_v1  ;;  %v476_v60 = vand.u32 4294901760, %v4330_v54  ;;  %v4979_v0 = vand.u32 4294901760, %v4239_v20  ;;  %v4980_v15 = vand.u32 4294901760, %v4321_v8  ;;  %v229_v54 = vld [vmem:[%s3904_s26 + $0xb8] sm:$0xff] }
  0x91   : > { %v756_v63 = vand.u32 4294901760, %v4353_v28  ;;  %v750_v55 = vsub.f32 %v4344_v4, %v749_v44  ;;  %3204 = vmatprep.subr.bf16.mxu1 %v3203_v5  ;;  %3300 = vmatprep.subr.bf16.mxu0 %v3299_v27  ;;  %v486_v6 = vand.u32 4294901760, %v485_v11  ;;  %v4385_v16 = vand.u32 4294901760, %v228_v51 }
  0x92   : > { %4978 = vst [vmem:[#allocation39_spill] sm:$0xff] %v4374_v40  ;;  %2719 = vmatmul.mubr.f32.gmra.mrb[10].mxu1 %v456_v46  ;;  %v495_v37 = vsub.f32 %v4321_v8, %v4980_v15  ;;  %v4982_v23 = vand.u32 4294901760, %v4242_v9  ;;  %v4985_v20 = vand.u32 4294901760, %v4336_v62  ;;  %v4987_v9 = vand.u32 4294901760, %v4347_v59 }
  0x93   : > { %v757_v19 = vsub.f32 %v4353_v28, %v756_v63  ;;  %v3303_v36 = vpack.c.bf16 %v756_v63, %v749_v44  ;;  %2959 = vmatmul.mubr.f32.gmra.mrb[10].mxu0 %v4979_v0  ;;  %4981 = vst [vmem:[#allocation40_spill] sm:$0xff] %v4385_v16  ;;  %v751_v52 = vand.u32 4294901760, %v750_v55  ;;  %2721 = vmatprep.mubr.f32.mxu1 %v466_v41  ;;  %v4983_v44 = vand.u32 4294901760, %v4333_v3 }
  0x94   : > { %2961 = vmatprep.mubr.f32.mxu0 %v4982_v23  ;;  %v4394_v63 = vsub.f32 %v226_v21, %v4366_v38  ;;  %v4984_v0 = vand.u32 4294901760, %v4011_v47  ;;  %v515_v55 = vsub.f32 %v4336_v62, %v4985_v20  ;;  %v4404_v23 = vsub.f32 %v227_v1, %v4374_v40  ;;  %3206 = vmatpush3.bf16.msra.mxu1 %v3203_v5 }
  0x95   : > { %v505_v46 = vsub.f32 %v4333_v3, %v4983_v44  ;;  %v758_v11 = vand.u32 4294901760, %v757_v19  ;;  %3302 = vmatpush3.bf16.msra.mxu0 %v3299_v27  ;;  %v230_v44 = vld [vmem:[%s3904_s26 + $0xc0] sm:$0xff]  ;;  %v4986_v21 = vand.u32 4294901760, %v4013_v48  ;;  %v4988_v1 = vand.u32 4294901760, %v4261_v56 }
  0x96   : > { %v762_v15 = vsub.f32 %v4011_v47, %v4984_v0  ;;  %v525_v47 = vsub.f32 %v4347_v59, %v4987_v9  ;;  %v4413_v0 = vand.u32 4294901760, %v229_v54  ;;  %3304 = vmatprep.subr.bf16.mxu0 %v3303_v36  ;;  %2722 = vmatmul.mubr.f32.gmra.mrb[12].mxu1 %v476_v60  ;;  %v496_v27 = vand.u32 4294901760, %v495_v37  ;;  %v232_v37 = vld [vmem:[%s3904_s26 + $0xd0] sm:$0xff] }
  0x97   : > { %v769_v19 = vsub.f32 %v4013_v48, %v4986_v21  ;;  %v3207_v20 = vpack.c.bf16 %v758_v11, %v751_v52  ;;  %2962 = vmatmul.mubr.f32.gmra.mrb[12].mxu0 %v4988_v1  ;;  %v4418_v5 = vsub.f32 %v228_v51, %v4385_v16  ;;  %2724 = vmatprep.mubr.f32.mxu1 %v486_v6  ;;  %v4989_v21 = vand.u32 4294901760, %v4278_v14  ;;  %v231_v11 = vld [vmem:[%s3904_s26 + $0xc8] sm:$0xff] }
  0x98   : > { %v763_v41 = vand.u32 4294901760, %v762_v15  ;;  %v506_v9 = vand.u32 4294901760, %v505_v46  ;;  %v4423_v52 = vand.u32 4294901760, %v230_v44  ;;  %v516_v60 = vand.u32 4294901760, %v515_v55 }
  0x99   : > { %v770_v48 = vand.u32 4294901760, %v769_v19  ;;  %2964 = vmatprep.mubr.f32.mxu0 %v4989_v21  ;;  %3208 = vmatprep.subr.bf16.mxu1 %v3207_v20  ;;  %v526_v16 = vand.u32 4294901760, %v525_v47  ;;  %v4990_v6 = vand.u32 4294901760, %v4372_v30  ;;  %v4432_v21 = vsub.f32 %v229_v54, %v4413_v0 }
  0x9a   : > { %v764_v38 = vsub.f32 %v762_v15, %v763_v41  ;;  %3306 = vmatpush3.bf16.msra.mxu0 %v3303_v36  ;;  %3210 = vmatpush3.bf16.msra.mxu1 %v3207_v20  ;;  %v4992_v55 = vand.u32 4294901760, %v4321_v8  ;;  %v4902_v36 = vand.u32 4294901760, %v4418_v5  ;;  %v4437_v56 = vand.u32 4294901760, %v231_v11 }
  0x9b   : > { %v771_v51 = vsub.f32 %v769_v19, %v770_v48  ;;  %v3307_v1 = vpack.c.bf16 %v770_v48, %v763_v41  ;;  %v535_v46 = vsub.f32 %v4372_v30, %v4990_v6  ;;  %4991 = vst [vmem:[#allocation41_spill] sm:$0xff] %v4432_v21  ;;  %2725 = vmatmul.mubr.f32.gmra.mrb[14].mxu1 %v496_v27  ;;  %v4993_v54 = vand.u32 4294901760, %v4333_v3  ;;  %v233_v6 = vld [vmem:[%s3904_s26 + $0xd8] sm:$0xff] }
  0x9c   : > { %v765_v40 = vand.u32 4294901760, %v764_v38  ;;  %2965 = vmatmul.mubr.f32.gmra.mrb[14].mxu0 %v4992_v55  ;;  %v4441_v47 = vpack.c.bf16 %v4045_v58, %v4040_v57  ;;  %2727 = vmatprep.mubr.f32.mxu1 %v506_v9  ;;  %v4994_v20 = vand.u32 4294901760, %v4394_v63  ;;  %v4449_v27 = vsub.f32 %v230_v44, %v4423_v52  ;;  %v234_v9 = vld [vmem:[%s3904_s26 + $0xe0] sm:$0xff] }
  0x9d   : > { %v772_v41 = vand.u32 4294901760, %v771_v51  ;;  %2967 = vmatprep.mubr.f32.mxu0 %v4993_v54  ;;  %v4451_v48 = vand.u32 4294901760, %v232_v37  ;;  %v4456_v51 = vpack.c.bf16 %v4091_v34, %v4086_v32  ;;  %v4996_v57 = vand.u32 4294901760, %v4404_v23  ;;  %3308 = vmatprep.subr.bf16.mxu0 %v3307_v1 }
  0x9e   : > { %v545_v38 = vsub.f32 %v4394_v63, %v4994_v20  ;;  %4995 = vst [vmem:[#allocation42_spill] sm:$0xff] %v4449_v27  ;;  %v4464_v54 = vpack.c.bf16 %v4147_v31, %v4134_v35  ;;  %v4468_v44 = vpack.c.bf16 %v4233_v49, %v4217_v2  ;;  %v574_v20 = vand.u32 4294901760, %v4432_v21  ;;  %3310 = vmatpush3.bf16.msra.mxu0 %v3307_v1  ;;  %v236_v1 = vld [vmem:[%s3904_s26 + $0xf0] sm:$0xff] }
  0x9f   : > { %v555_v58 = vsub.f32 %v4404_v23, %v4996_v57  ;;  %v3211_v55 = vpack.c.bf16 %v772_v41, %v765_v40  ;;  %v4473_v32 = vpack.c.bf16 %v4291_v61, %v4286_v22  ;;  %v4477_v34 = vpack.c.bf16 %v4353_v28, %v4344_v4  ;;  %2728 = vmatmul.mubr.f32.gmra.mrb[16].mxu1 %v516_v60  ;;  %v235_v60 = vld [vmem:[%s3904_s26 + $0xe8] sm:$0xff] }
  0xa0   : > { %v4479_v40 = vpack.c.bf16 %v769_v19, %v762_v15  ;;  %v4997_v35 = vand.u32 4294901760, %v4336_v62  ;;  %v536_v49 = vand.u32 4294901760, %v535_v46  ;;  %v565_v2 = vsub.f32 %v4418_v5, %v4902_v36  ;;  %2730 = vmatprep.mubr.f32.mxu1 %v526_v16  ;;  %3312 = vmatprep.subr.bf16.mxu0 %v3924_v10 }
  0xa1   : > { %v4487_v31 = vsub.f32 %v231_v11, %v4437_v56  ;;  %v4489_v22 = vand.u32 4294901760, %v233_v6  ;;  %v4999_v28 = vand.u32 4294901760, %v4347_v59  ;;  %v546_v4 = vand.u32 4294901760, %v545_v38  ;;  %3212 = vmatprep.subr.bf16.mxu1 %v3211_v55 }
  0xa2   : > { %2968 = vmatmul.mubr.f32.gmra.mrb[16].mxu0 %v4997_v35  ;;  %v584_v61 = vand.u32 4294901760, %v4449_v27  ;;  %v4495_v15 = vsub.f32 %v232_v37, %v4451_v48  ;;  %v4497_v19 = vand.u32 4294901760, %v234_v9  ;;  %v4503_v11 = vpack.c.bf16 %v4003_v42, %v3991_v39  ;;  %3214 = vmatpush3.bf16.msra.mxu1 %v3211_v55 }
  0xa3   : > { %4998 = vst [vmem:[#allocation43_spill] sm:$0xff] %v4487_v31  ;;  %2970 = vmatprep.mubr.f32.mxu0 %v4999_v28  ;;  %v556_v16 = vand.u32 4294901760, %v555_v58  ;;  %v575_v46 = vsub.f32 %v4432_v21, %v574_v20  ;;  %2731 = vmatmul.mubr.f32.gmra.mrb[18].mxu1 %v536_v49  ;;  %v5001_v37 = vand.u32 4294901760, %v4372_v30  ;;  %v566_v41 = vand.u32 4294901760, %v565_v2  ;;  %v237_v2 = vld [vmem:[%s3904_s26 + $0xf8] sm:$0xff] }
  0xa4   : > { %5000 = vst [vmem:[#allocation44_spill] sm:$0xff] %v4495_v15  ;;  %v594_v38 = vand.u32 4294901760, %v4487_v31  ;;  %v4511_v57 = vsub.f32 %v233_v6, %v4489_v22  ;;  %v4513_v35 = vand.u32 4294901760, %v235_v60  ;;  %2733 = vmatprep.mubr.f32.mxu1 %v546_v4  ;;  %v5002_v39 = vand.u32 4294901760, %v4394_v63  ;;  %3216 = vmatprep.subr.bf16.mxu1 %v4503_v11 }
  0xa5   : > { %v585_v42 = vsub.f32 %v4449_v27, %v584_v61  ;;  %v604_v58 = vand.u32 4294901760, %v4495_v15  ;;  %v4520_v55 = vsub.f32 %v234_v9, %v4497_v19  ;;  %v4522_v49 = vand.u32 4294901760, %v236_v1 }
  0xa6   : > { %2971 = vmatmul.mubr.f32.gmra.mrb[18].mxu0 %v5001_v37  ;;  %v576_v6 = vand.u32 4294901760, %v575_v46  ;;  %v5003_v28 = vand.u32 4294901760, %v4404_v23  ;;  %v595_v4 = vsub.f32 %v4487_v31, %v594_v38  ;;  %v614_v37 = vand.u32 4294901760, %v4511_v57 }
  0xa7   : > { %2973 = vmatprep.mubr.f32.mxu0 %v5002_v39  ;;  %2734 = vmatmul.mubr.f32.gmra.mrb[20].mxu1 %v556_v16  ;;  %v4531_v39 = vsub.f32 %v235_v60, %v4513_v35  ;;  %v4533_v36 = vand.u32 4294901760, %v237_v2  ;;  %v5004_v9 = vand.u32 4294901760, %v4418_v5  ;;  %v586_v27 = vand.u32 4294901760, %v585_v42 }
  0xa8   : > { %2736 = vmatprep.mubr.f32.mxu1 %v566_v41  ;;  %v605_v46 = vsub.f32 %v4495_v15, %v604_v58  ;;  %v624_v16 = vand.u32 4294901760, %v4520_v55  ;;  %v596_v31 = vand.u32 4294901760, %v595_v4  ;;  %v615_v60 = vsub.f32 %v4511_v57, %v614_v37 }
  0xa9   : > { %v634_v21 = vand.u32 4294901760, %v4531_v39  ;;  %v4545_v41 = vsub.f32 %v237_v2, %v4533_v36 }
  0xaa   : > { %2974 = vmatmul.mubr.f32.gmra.mrb[20].mxu0 %v5003_v28  ;;  %v4540_v28 = vsub.f32 %v236_v1, %v4522_v49  ;;  %v606_v42 = vand.u32 4294901760, %v605_v46  ;;  %v616_v1 = vand.u32 4294901760, %v615_v60  ;;  %v5022_v60 = vld [vmem:[#allocation14_spill] sm:$0xff] }
  0xab   : > { %2976 = vmatprep.mubr.f32.mxu0 %v5004_v9  ;;  %2737 = vmatmul.mubr.f32.gmra.mrb[22].mxu1 %v576_v6  ;;  %v625_v9 = vsub.f32 %v4520_v55, %v624_v16  ;;  %v654_v6 = vand.u32 4294901760, %v4545_v41 }
  0xac   : > { %2739 = vmatprep.mubr.f32.mxu1 %v586_v27  ;;  %v644_v15 = vand.u32 4294901760, %v4540_v28 }
  0xad   : > { %v626_v4 = vand.u32 4294901760, %v625_v9  ;;  %v5024_v9 = vld [vmem:[#allocation17_spill] sm:$0xff] }
  0xae   : > { %2977 = vmatmul.mubr.f32.gmra.mrb[22].mxu0 %v574_v20  ;;  %v635_v20 = vsub.f32 %v4531_v39, %v634_v21  ;;  %v645_v2 = vsub.f32 %v4540_v28, %v644_v15 }
  0xaf   : > { %2979 = vmatprep.mubr.f32.mxu0 %v584_v61  ;;  %2740 = vmatmul.mubr.f32.gmra.mrb[24].mxu1 %v596_v31  ;;  %v655_v61 = vsub.f32 %v4545_v41, %v654_v6 }
  0xb0   : > { %2742 = vmatprep.mubr.f32.mxu1 %v606_v42  ;;  %v636_v27 = vand.u32 4294901760, %v635_v20  ;;  %v646_v46 = vand.u32 4294901760, %v645_v2  ;;  %v5023_v42 = vld [vmem:[#allocation16_spill] sm:$0xff]  ;;  %v5034_v2 = vld [vmem:[#allocation37_spill] sm:$0xff] }
  0xb1   : > { %v656_v31 = vand.u32 4294901760, %v655_v61  ;;  %v5026_v20 = vld [vmem:[#allocation24_spill] sm:$0xff] }
  0xb2   : > { %2980 = vmatmul.mubr.f32.gmra.mrb[24].mxu0 %v594_v38  ;;  %v5015_v38 = vld [vmem:[#allocation33_spill] sm:$0xff] }
  0xb3   : > { %2982 = vmatprep.mubr.f32.mxu0 %v604_v58  ;;  %2743 = vmatmul.mubr.f32.gmra.mrb[26].mxu1 %v616_v1  ;;  %v5016_v58 = vld [vmem:[#allocation36_spill] sm:$0xff]  ;;  %v5025_v1 = vld [vmem:[#allocation19_spill] sm:$0xff] }
  0xb4   : > { %2745 = vmatprep.mubr.f32.mxu1 %v626_v4  ;;  %v5033_v4 = vld [vmem:[#allocation35_spill] sm:$0xff] }
  0xb6   : > { %2983 = vmatmul.mubr.f32.gmra.mrb[26].mxu0 %v614_v37  ;;  %v5019_v37 = vld [vmem:[#allocation39_spill] sm:$0xff] }
  0xb7   : > { %2985 = vmatprep.mubr.f32.mxu0 %v624_v16  ;;  %2746 = vmatmul.mubr.f32.gmra.mrb[28].mxu1 %v636_v27  ;;  %v5021_v16 = vld [vmem:[#allocation11_spill] sm:$0xff] }
  0xb8   : > { %2748 = vmatprep.mubr.f32.mxu1 %v646_v46 }
  0xba   : > { %2986 = vmatmul.mubr.f32.gmra.mrb[28].mxu0 %v634_v21  ;;  %v5006_v21 = vld [vmem:[#allocation22_spill] sm:$0xff] }
  0xbb   : > { %2988 = vmatprep.mubr.f32.mxu0 %v644_v15  ;;  %2749 = vmatmul.mubr.f32.gmra.mrb[30].mxu1 %v656_v31  ;;  %v5009_v15 = vld [vmem:[#allocation25_spill] sm:$0xff] }
  0xbc   : > { %2783 = vmatprep.mubr.f32.mxu1 %v3943_v17 }
  0xbe   : > { %2989 = vmatmul.mubr.f32.gmra.mrb[30].mxu0 %v654_v6  ;;  %v5032_v6 = vld [vmem:[#allocation34_spill] sm:$0xff] }
  0xbf   : > { %3023 = vmatprep.mubr.f32.mxu0 %v3943_v17  ;;  %2784 = vmatmul.mubr.f32.vlgmr.msra.gmra.mrb[0].mxu1 %v3982_v33 }
  0xc0   : > { %3218 = vmatpush3.bf16.msra.mxu1 %v4503_v11  ;;  %2786 = vmatprep.mubr.f32.mxu1 %v4005_v43  ;;  %v5013_v11 = vld [vmem:[#allocation31_spill] sm:$0xff] }
  0xc1   : > { %3220 = vmatprep.subr.bf16.mxu1 %v4441_v47 }
  0xc2   : > { %3024 = vmatmul.mubr.f32.vlgmr.msra.gmra.mrb[0].mxu0 %v3982_v33 }
  0xc3   : > { %3026 = vmatprep.mubr.f32.mxu0 %v4005_v43  ;;  %3314 = vmatpush3.bf16.msra.mxu0 %v3924_v10  ;;  %v5005_v10 = vld [vmem:[#allocation20_spill] sm:$0xff] }
  0xc4   : > { %3316 = vmatprep.subr.bf16.mxu0 %v3932_v13  ;;  %2787 = vmatmul.mubr.f32.gmra.mrb[2].mxu1 %v4008_v45 }
  0xc5   : > { %2789 = vmatprep.mubr.f32.mxu1 %v4028_v53  ;;  %3222 = vmatpush3.bf16.msra.mxu1 %v4441_v47  ;;  %v5007_v47 = vld [vmem:[#allocation12_spill] sm:$0xff] }
  0xc6   : > { %3027 = vmatmul.mubr.f32.gmra.mrb[2].mxu0 %v4008_v45  ;;  %3224 = vmatprep.subr.bf16.mxu1 %v4456_v51 }
  0xc7   : > { %3029 = vmatprep.mubr.f32.mxu0 %v4028_v53  ;;  %3318 = vmatpush3.bf16.msra.mxu0 %v3932_v13  ;;  %v5008_v13 = vld [vmem:[#allocation23_spill] sm:$0xff] }
  0xc8   : > { %3320 = vmatprep.subr.bf16.mxu0 %v3951_v18  ;;  %2790 = vmatmul.mubr.f32.gmra.mrb[4].mxu1 %v5005_v10 }
  0xc9   : > { %2792 = vmatprep.mubr.f32.mxu1 %v5006_v21  ;;  %3226 = vmatpush3.bf16.msra.mxu1 %v4456_v51  ;;  %v5010_v51 = vld [vmem:[#allocation13_spill] sm:$0xff] }
  0xca   : > { %3030 = vmatmul.mubr.f32.gmra.mrb[4].mxu0 %v5005_v10  ;;  %3228 = vmatprep.subr.bf16.mxu1 %v4464_v54 }
  0xcb   : > { %3032 = vmatprep.mubr.f32.mxu0 %v5006_v21  ;;  %3322 = vmatpush3.bf16.msra.mxu0 %v3951_v18  ;;  %v5011_v18 = vld [vmem:[#allocation28_spill] sm:$0xff] }
  0xcc   : > { %3324 = vmatprep.subr.bf16.mxu0 %v5007_v47  ;;  %2793 = vmatmul.mubr.f32.gmra.mrb[6].mxu1 %v5008_v13 }
  0xcd   : > { %2795 = vmatprep.mubr.f32.mxu1 %v5009_v15  ;;  %3230 = vmatpush3.bf16.msra.mxu1 %v4464_v54  ;;  %v5012_v54 = vld [vmem:[#allocation15_spill] sm:$0xff] }
  0xce   : > { %3033 = vmatmul.mubr.f32.gmra.mrb[6].mxu0 %v5008_v13  ;;  %3232 = vmatprep.subr.bf16.mxu1 %v4468_v44 }
  0xcf   : > { %3035 = vmatprep.mubr.f32.mxu0 %v5009_v15  ;;  %3326 = vmatpush3.bf16.msra.mxu0 %v5007_v47 }
  0xd0   : > { %3328 = vmatprep.subr.bf16.mxu0 %v5010_v51  ;;  %2796 = vmatmul.mubr.f32.gmra.mrb[8].mxu1 %v5011_v18 }
  0xd1   : > { %2798 = vmatprep.mubr.f32.mxu1 %v4185_v24  ;;  %3234 = vmatpush3.bf16.msra.mxu1 %v4468_v44  ;;  %v5014_v44 = vld [vmem:[#allocation18_spill] sm:$0xff] }
  0xd2   : > { %3036 = vmatmul.mubr.f32.gmra.mrb[8].mxu0 %v5011_v18  ;;  %3236 = vmatprep.subr.bf16.mxu1 %v4473_v32 }
  0xd3   : > { %3038 = vmatprep.mubr.f32.mxu0 %v4185_v24  ;;  %3330 = vmatpush3.bf16.msra.mxu0 %v5010_v51 }
  0xd4   : > { %3332 = vmatprep.subr.bf16.mxu0 %v5012_v54  ;;  %2799 = vmatmul.mubr.f32.gmra.mrb[10].mxu1 %v4192_v25 }
  0xd5   : > { %2801 = vmatprep.mubr.f32.mxu1 %v5013_v11  ;;  %3238 = vmatpush3.bf16.msra.mxu1 %v4473_v32  ;;  %v5017_v32 = vld [vmem:[#allocation21_spill] sm:$0xff] }
  0xd6   : > { %3039 = vmatmul.mubr.f32.gmra.mrb[10].mxu0 %v4192_v25  ;;  %3240 = vmatprep.subr.bf16.mxu1 %v4477_v34 }
  0xd7   : > { %3041 = vmatprep.mubr.f32.mxu0 %v5013_v11  ;;  %3334 = vmatpush3.bf16.msra.mxu0 %v5012_v54 }
  0xd8   : > { %3336 = vmatprep.subr.bf16.mxu0 %v5014_v44  ;;  %2802 = vmatmul.mubr.f32.gmra.mrb[12].mxu1 %v5015_v38 }
  0xd9   : > { %2804 = vmatprep.mubr.f32.mxu1 %v5016_v58  ;;  %3242 = vmatpush3.bf16.msra.mxu1 %v4477_v34  ;;  %v5018_v34 = vld [vmem:[#allocation38_spill] sm:$0xff] }
  0xda   : > { %3042 = vmatmul.mubr.f32.gmra.mrb[12].mxu0 %v5015_v38  ;;  %3244 = vmatprep.subr.bf16.mxu1 %v4479_v40 }
  0xdb   : > { %3044 = vmatprep.mubr.f32.mxu0 %v5016_v58  ;;  %3338 = vmatpush3.bf16.msra.mxu0 %v5014_v44 }
  0xdc   : > { %3340 = vmatprep.subr.bf16.mxu0 %v5017_v32  ;;  %2805 = vmatmul.mubr.f32.gmra.mrb[14].mxu1 %v4280_v12 }
  0xdd   : > { %2807 = vmatprep.mubr.f32.mxu1 %v4299_v7  ;;  %3246 = vmatpush3.bf16.msra.mxu1 %v4479_v40  ;;  %v5020_v40 = vld [vmem:[#allocation40_spill] sm:$0xff] }
  0xde   : > { %3045 = vmatmul.mubr.f32.gmra.mrb[14].mxu0 %v4280_v12 }
  0xdf   : > { %3047 = vmatprep.mubr.f32.mxu0 %v4299_v7  ;;  %3342 = vmatpush3.bf16.msra.mxu0 %v5017_v32 }
  0xe0   : > { %2808 = vmatmul.mubr.f32.gmra.mrb[16].mxu1 %v4301_v29 }
  0xe1   : > { %2810 = vmatprep.mubr.f32.mxu1 %v4314_v50 }
  0xe2   : > { %3048 = vmatmul.mubr.f32.gmra.mrb[16].mxu0 %v4301_v29 }
  0xe3   : > { %3050 = vmatprep.mubr.f32.mxu0 %v4314_v50 }
  0xe4   : > { %2811 = vmatmul.mubr.f32.gmra.mrb[18].mxu1 %v4338_v26 }
  0xe5   : > { %2813 = vmatprep.mubr.f32.mxu1 %v5018_v34 }
  0xe6   : > { %3051 = vmatmul.mubr.f32.gmra.mrb[18].mxu0 %v4338_v26 }
  0xe7   : > { %3053 = vmatprep.mubr.f32.mxu0 %v5018_v34 }
  0xe8   : > { %2814 = vmatmul.mubr.f32.gmra.mrb[20].mxu1 %v5019_v37 }
  0xe9   : > { %2816 = vmatprep.mubr.f32.mxu1 %v5020_v40 }
  0xea   : > { %3054 = vmatmul.mubr.f32.gmra.mrb[20].mxu0 %v5019_v37 }
  0xeb   : > { %3056 = vmatprep.mubr.f32.mxu0 %v5020_v40 }
  0xec   : > { %2817 = vmatmul.mubr.f32.gmra.mrb[22].mxu1 %v4413_v0 }
  0xed   : > { %2819 = vmatprep.mubr.f32.mxu1 %v4423_v52 }
  0xee   : > { %3057 = vmatmul.mubr.f32.gmra.mrb[22].mxu0 %v4413_v0 }
  0xef   : > { %3059 = vmatprep.mubr.f32.mxu0 %v4423_v52 }
  0xf0   : > { %2820 = vmatmul.mubr.f32.gmra.mrb[24].mxu1 %v4437_v56 }
  0xf1   : > { %2822 = vmatprep.mubr.f32.mxu1 %v4451_v48 }
  0xf2   : > { %3060 = vmatmul.mubr.f32.gmra.mrb[24].mxu0 %v4437_v56 }
  0xf3   : > { %3062 = vmatprep.mubr.f32.mxu0 %v4451_v48 }
  0xf4   : > { %2823 = vmatmul.mubr.f32.gmra.mrb[26].mxu1 %v4489_v22 }
  0xf5   : > { %2825 = vmatprep.mubr.f32.mxu1 %v4497_v19 }
  0xf6   : > { %3063 = vmatmul.mubr.f32.gmra.mrb[26].mxu0 %v4489_v22 }
  0xf7   : > { %3065 = vmatprep.mubr.f32.mxu0 %v4497_v19 }
  0xf8   : > { %2826 = vmatmul.mubr.f32.gmra.mrb[28].mxu1 %v4513_v35 }
  0xf9   : > { %2828 = vmatprep.mubr.f32.mxu1 %v4522_v49 }
  0xfa   : > { %3066 = vmatmul.mubr.f32.gmra.mrb[28].mxu0 %v4513_v35 }
  0xfb   : > { %3068 = vmatprep.mubr.f32.mxu0 %v4522_v49 }
  0xfc   : > { %2829 = vmatmul.mubr.f32.gmra.mrb[30].mxu1 %v4533_v36 }
  0xfd   : > { %2863 = vmatprep.mubr.f32.mxu1 %v5021_v16 }
  0xfe   : > { %3069 = vmatmul.mubr.f32.gmra.mrb[30].mxu0 %v4533_v36 }
  0xff   : > { %3103 = vmatprep.mubr.f32.mxu0 %v3943_v17  ;;  %v5027_v17 = vld [vmem:[#allocation26_spill] sm:$0xff] }
 0x100   : > { %2864 = vmatmul.mubr.f32.vlgmr.msra.gmra.mrb[0].mxu1 %v5022_v60 }
 0x101   : > { %2866 = vmatprep.mubr.f32.mxu1 %v5023_v42 }
 0x102   : > { %3104 = vmatmul.mubr.f32.vlgmr.msra.gmra.mrb[0].mxu0 %v3982_v33  ;;  %v5028_v33 = vld [vmem:[#allocation27_spill] sm:$0xff] }
 0x103   : > { %3106 = vmatprep.mubr.f32.mxu0 %v4005_v43  ;;  %v5029_v43 = vld [vmem:[#allocation29_spill] sm:$0xff] }
 0x104   : > { %2867 = vmatmul.mubr.f32.gmra.mrb[2].mxu1 %v5024_v9 }
 0x105   : > { %2869 = vmatprep.mubr.f32.mxu1 %v5025_v1 }
 0x106   : > { %3107 = vmatmul.mubr.f32.gmra.mrb[2].mxu0 %v4008_v45  ;;  %v5030_v45 = vld [vmem:[#allocation30_spill] sm:$0xff] }
 0x107   : > { %3109 = vmatprep.mubr.f32.mxu0 %v4028_v53  ;;  %v5031_v53 = vld [vmem:[#allocation32_spill] sm:$0xff] }
 0x108   : > { %2870 = vmatmul.mubr.f32.gmra.mrb[4].mxu1 %v5026_v20 }
 0x109   : > { %2872 = vmatprep.mubr.f32.mxu1 %v5027_v17 }
 0x10a   : > { %3110 = vmatmul.mubr.f32.gmra.mrb[4].mxu0 %v5005_v10 }
 0x10b   : > { %3112 = vmatprep.mubr.f32.mxu0 %v5006_v21 }
 0x10c   : > { %2873 = vmatmul.mubr.f32.gmra.mrb[6].mxu1 %v5028_v33 }
 0x10d   : > { %2875 = vmatprep.mubr.f32.mxu1 %v5029_v43 }
 0x10e   : > { %3113 = vmatmul.mubr.f32.gmra.mrb[6].mxu0 %v5008_v13 }
 0x10f   : > { %3115 = vmatprep.mubr.f32.mxu0 %v5009_v15 }
 0x110   : > { %2876 = vmatmul.mubr.f32.gmra.mrb[8].mxu1 %v5030_v45 }
 0x111   : > { %2878 = vmatprep.mubr.f32.mxu1 %v5031_v53 }
 0x112   : > { %3116 = vmatmul.mubr.f32.gmra.mrb[8].mxu0 %v5011_v18 }
 0x113   : > { %3118 = vmatprep.mubr.f32.mxu0 %v4185_v24  ;;  %v5037_v24 = vld [vmem:[#allocation43_spill] sm:$0xff] }
 0x114   : > { %2879 = vmatmul.mubr.f32.gmra.mrb[10].mxu1 %v5032_v6 }
 0x115   : > { %2881 = vmatprep.mubr.f32.mxu1 %v5033_v4 }
 0x116   : > { %3119 = vmatmul.mubr.f32.gmra.mrb[10].mxu0 %v4192_v25  ;;  %v5035_v25 = vld [vmem:[#allocation41_spill] sm:$0xff] }
 0x117   : > { %3121 = vmatprep.mubr.f32.mxu0 %v5013_v11 }
 0x118   : > { %2882 = vmatmul.mubr.f32.gmra.mrb[12].mxu1 %v5034_v2 }
 0x119   : > { %2884 = vmatprep.mubr.f32.mxu1 %v4278_v14 }
 0x11a   : > { %3122 = vmatmul.mubr.f32.gmra.mrb[12].mxu0 %v5015_v38 }
 0x11b   : > { %3124 = vmatprep.mubr.f32.mxu0 %v5016_v58 }
 0x11c   : > { %2885 = vmatmul.mubr.f32.gmra.mrb[14].mxu1 %v4321_v8  ;;  %v5036_v8 = vld [vmem:[#allocation42_spill] sm:$0xff] }
 0x11d   : > { %2887 = vmatprep.mubr.f32.mxu1 %v4333_v3 }
 0x11e   : > { %3125 = vmatmul.mubr.f32.gmra.mrb[14].mxu0 %v4280_v12  ;;  %v5038_v12 = vld [vmem:[#allocation44_spill] sm:$0xff] }
 0x11f   : > { %3127 = vmatprep.mubr.f32.mxu0 %v4299_v7 }
 0x120   : > { %2888 = vmatmul.mubr.f32.gmra.mrb[16].mxu1 %v4336_v62 }
 0x121   : > { %2890 = vmatprep.mubr.f32.mxu1 %v4347_v59 }
 0x122   : > { %3128 = vmatmul.mubr.f32.gmra.mrb[16].mxu0 %v4301_v29 }
 0x123   : > { %3130 = vmatprep.mubr.f32.mxu0 %v4314_v50 }
 0x124   : > { %2891 = vmatmul.mubr.f32.gmra.mrb[18].mxu1 %v4372_v30 }
 0x125   : > { %2893 = vmatprep.mubr.f32.mxu1 %v4394_v63 }
 0x126   : > { %3131 = vmatmul.mubr.f32.gmra.mrb[18].mxu0 %v4338_v26 }
 0x127   : > { %3133 = vmatprep.mubr.f32.mxu0 %v5018_v34 }
 0x128   : > { %2894 = vmatmul.mubr.f32.gmra.mrb[20].mxu1 %v4404_v23 }
 0x129   : > { %2896 = vmatprep.mubr.f32.mxu1 %v4418_v5 }
 0x12a   : > { %3134 = vmatmul.mubr.f32.gmra.mrb[20].mxu0 %v5019_v37 }
 0x12b   : > { %3136 = vmatprep.mubr.f32.mxu0 %v5020_v40 }
 0x12c   : > { %2897 = vmatmul.mubr.f32.gmra.mrb[22].mxu1 %v5035_v25 }
 0x12d   : > { %2899 = vmatprep.mubr.f32.mxu1 %v5036_v8 }
 0x12e   : > { %3137 = vmatmul.mubr.f32.gmra.mrb[22].mxu0 %v4413_v0 }
 0x12f   : > { %3139 = vmatprep.mubr.f32.mxu0 %v4423_v52 }
 0x130   : > { %2900 = vmatmul.mubr.f32.gmra.mrb[24].mxu1 %v5037_v24 }
 0x131   : > { %2902 = vmatprep.mubr.f32.mxu1 %v5038_v12 }
 0x132   : > { %3140 = vmatmul.mubr.f32.gmra.mrb[24].mxu0 %v4437_v56  ;;  %v4714_v56 = vld [vmem:[%s4837_s2] ss:$0 sm:$0xff] }
 0x133   : > { %3142 = vmatprep.mubr.f32.mxu0 %v4451_v48 }
 0x134   : > { %2903 = vmatmul.mubr.f32.gmra.mrb[26].mxu1 %v4511_v57 }
 0x135   : > { %2905 = vmatprep.mubr.f32.mxu1 %v4520_v55 }
 0x136   : > { %3143 = vmatmul.mubr.f32.gmra.mrb[26].mxu0 %v4489_v22 }
 0x137   : > { %3145 = vmatprep.mubr.f32.mxu0 %v4497_v19 }
 0x138   : > { %2906 = vmatmul.mubr.f32.gmra.mrb[28].mxu1 %v4531_v39 }
 0x139   : > { %2908 = vmatprep.mubr.f32.mxu1 %v4540_v28 }
 0x13a   : > { %3146 = vmatmul.mubr.f32.gmra.mrb[28].mxu0 %v4513_v35 }
 0x13b   : > { %3148 = vmatprep.mubr.f32.mxu0 %v4522_v49 }
 0x13c   : > { %2909 = vmatmul.mubr.f32.gmra.mrb[30].mxu1 %v4545_v41 }
 0x13e   : > { %3149 = vmatmul.mubr.f32.gmra.mrb[30].mxu0 %v4533_v36 }
 0x1d3   : > { %v2865_v14 = vpop.f32.mrb[0].mxu1 }
 0x1d4   : > { %v3343_v29 = vadd.f32 %v2865_v14, %v4714_v56  ;;  %v1099_v50 = vpop.f32.mrb[1].mxu1 }
 0x1d5   : > { %v3105_v7 = vpop.f32.mrb[0].mxu0  ;;  %v3345_v62 = vadd.f32 %v4714_v56, %v1099_v50 }
 0x1d6   : > { %v2045_v3 = vpop.f32.mrb[1].mxu0  ;;  %v3344_v26 = vadd.f32 %v3343_v29, %v3105_v7 }
 0x1d7   : > { %v3346_v59 = vadd.f32 %v3345_v62, %v2045_v3  ;;  %v2868_v30 = vpop.f32.mrb[2].mxu1 }
 0x1d8   : > { %2236 = vst [vmem:[%s4720_s8 + $0x8] sm:$0xff] %v3344_v26  ;;  %v3347_v23 = vadd.f32 %v2868_v30, %v4714_v56  ;;  %v1113_v0 = vpop.f32.mrb[3].mxu1 }
 0x1d9   : > { %v3108_v63 = vpop.f32.mrb[2].mxu0  ;;  %2235 = vst [vmem:[%s4720_s8] sm:$0xff] %v3346_v59  ;;  %v3349_v52 = vadd.f32 %v4714_v56, %v1113_v0 }
 0x1da   : > { %v2057_v5 = vpop.f32.mrb[3].mxu0  ;;  %v3348_v36 = vadd.f32 %v3347_v23, %v3108_v63 }
 0x1db   : > { %v3350_v48 = vadd.f32 %v3349_v52, %v2057_v5  ;;  %v2871_v22 = vpop.f32.mrb[4].mxu1 }
 0x1dc   : > { %2238 = vst [vmem:[%s4720_s8 + $0x18] sm:$0xff] %v3348_v36  ;;  %v3351_v57 = vadd.f32 %v2871_v22, %v4714_v56  ;;  %v1127_v35 = vpop.f32.mrb[5].mxu1 }
 0x1dd   : > { %v3111_v19 = vpop.f32.mrb[4].mxu0  ;;  %2237 = vst [vmem:[%s4720_s8 + $0x10] sm:$0xff] %v3350_v48  ;;  %v3353_v49 = vadd.f32 %v4714_v56, %v1127_v35 }
 0x1de   : > { %v2069_v55 = vpop.f32.mrb[5].mxu0  ;;  %v3352_v39 = vadd.f32 %v3351_v57, %v3111_v19 }
 0x1df   : > { %v3354_v28 = vadd.f32 %v3353_v49, %v2069_v55  ;;  %v2874_v41 = vpop.f32.mrb[6].mxu1 }
 0x1e0   : > { %2240 = vst [vmem:[%s4720_s8 + $0x28] sm:$0xff] %v3352_v39  ;;  %v3355_v61 = vadd.f32 %v2874_v41, %v4714_v56  ;;  %v1141_v46 = vpop.f32.mrb[7].mxu1 }
 0x1e1   : > { %v3114_v27 = vpop.f32.mrb[6].mxu0  ;;  %2239 = vst [vmem:[%s4720_s8 + $0x20] sm:$0xff] %v3354_v28  ;;  %v3357_v10 = vadd.f32 %v4714_v56, %v1141_v46 }
 0x1e2   : > { %v2081_v31 = vpop.f32.mrb[7].mxu0  ;;  %v3356_v21 = vadd.f32 %v3355_v61, %v3114_v27 }
 0x1e3   : > { %v3358_v47 = vadd.f32 %v3357_v10, %v2081_v31  ;;  %v2877_v13 = vpop.f32.mrb[8].mxu1 }
 0x1e4   : > { %2242 = vst [vmem:[%s4720_s8 + $0x38] sm:$0xff] %v3356_v21  ;;  %v3359_v51 = vadd.f32 %v2877_v13, %v4714_v56  ;;  %v1155_v18 = vpop.f32.mrb[9].mxu1 }
 0x1e5   : > { %v3117_v15 = vpop.f32.mrb[8].mxu0  ;;  %2241 = vst [vmem:[%s4720_s8 + $0x30] sm:$0xff] %v3358_v47  ;;  %v3361_v11 = vadd.f32 %v4714_v56, %v1155_v18 }
 0x1e6   : > { %v2093_v54 = vpop.f32.mrb[9].mxu0  ;;  %v3360_v44 = vadd.f32 %v3359_v51, %v3117_v15 }
 0x1e7   : > { %v3362_v38 = vadd.f32 %v3361_v11, %v2093_v54  ;;  %v2880_v58 = vpop.f32.mrb[10].mxu1 }
 0x1e8   : > { %2244 = vst [vmem:[%s4720_s8 + $0x48] sm:$0xff] %v3360_v44  ;;  %v3363_v34 = vadd.f32 %v2880_v58, %v4714_v56  ;;  %v1169_v37 = vpop.f32.mrb[11].mxu1 }
 0x1e9   : > { %v3120_v32 = vpop.f32.mrb[10].mxu0  ;;  %2243 = vst [vmem:[%s4720_s8 + $0x40] sm:$0xff] %v3362_v38  ;;  %v3365_v16 = vadd.f32 %v4714_v56, %v1169_v37 }
 0x1ea   : > { %v2105_v40 = vpop.f32.mrb[11].mxu0  ;;  %v3364_v60 = vadd.f32 %v3363_v34, %v3120_v32 }
 0x1eb   : > { %v3366_v42 = vadd.f32 %v3365_v16, %v2105_v40  ;;  %v2883_v9 = vpop.f32.mrb[12].mxu1 }
 0x1ec   : > { %2246 = vst [vmem:[%s4720_s8 + $0x58] sm:$0xff] %v3364_v60  ;;  %v3367_v20 = vadd.f32 %v2883_v9, %v4714_v56  ;;  %v1183_v17 = vpop.f32.mrb[13].mxu1 }
 0x1ed   : > { %v3123_v1 = vpop.f32.mrb[12].mxu0  ;;  %2245 = vst [vmem:[%s4720_s8 + $0x50] sm:$0xff] %v3366_v42  ;;  %v3369_v43 = vadd.f32 %v4714_v56, %v1183_v17 }
 0x1ee   : > { %v2117_v33 = vpop.f32.mrb[13].mxu0  ;;  %v3368_v45 = vadd.f32 %v3367_v20, %v3123_v1 }
 0x1ef   : > { %v3370_v53 = vadd.f32 %v3369_v43, %v2117_v33  ;;  %v2886_v6 = vpop.f32.mrb[14].mxu1 }
 0x1f0   : > { %2248 = vst [vmem:[%s4720_s8 + $0x68] sm:$0xff] %v3368_v45  ;;  %v3371_v2 = vadd.f32 %v2886_v6, %v4714_v56  ;;  %v1197_v25 = vpop.f32.mrb[15].mxu1 }
 0x1f1   : > { %v3126_v4 = vpop.f32.mrb[14].mxu0  ;;  %2247 = vst [vmem:[%s4720_s8 + $0x60] sm:$0xff] %v3370_v53  ;;  %v3373_v24 = vadd.f32 %v4714_v56, %v1197_v25 }
 0x1f2   : > { %v2129_v8 = vpop.f32.mrb[15].mxu0  ;;  %v3372_v12 = vadd.f32 %v3371_v2, %v3126_v4 }
 0x1f3   : > { %v3374_v14 = vadd.f32 %v3373_v24, %v2129_v8  ;;  %v2889_v7 = vpop.f32.mrb[16].mxu1 }
 0x1f4   : > { %2250 = vst [vmem:[%s4720_s8 + $0x78] sm:$0xff] %v3372_v12  ;;  %v3375_v50 = vadd.f32 %v2889_v7, %v4714_v56  ;;  %v1211_v3 = vpop.f32.mrb[17].mxu1 }
 0x1f5   : > { %v3129_v29 = vpop.f32.mrb[16].mxu0  ;;  %2249 = vst [vmem:[%s4720_s8 + $0x70] sm:$0xff] %v3374_v14  ;;  %v3377_v26 = vadd.f32 %v4714_v56, %v1211_v3 }
 0x1f6   : > { %v2141_v62 = vpop.f32.mrb[17].mxu0  ;;  %v3376_v59 = vadd.f32 %v3375_v50, %v3129_v29 }
 0x1f7   : > { %v3378_v30 = vadd.f32 %v3377_v26, %v2141_v62  ;;  %v2892_v63 = vpop.f32.mrb[18].mxu1 }
 0x1f8   : > { %2252 = vst [vmem:[%s4720_s8 + $0x88] sm:$0xff] %v3376_v59  ;;  %v3379_v0 = vadd.f32 %v2892_v63, %v4714_v56  ;;  %v1225_v5 = vpop.f32.mrb[19].mxu1 }
 0x1f9   : > { %v3132_v23 = vpop.f32.mrb[18].mxu0  ;;  %2251 = vst [vmem:[%s4720_s8 + $0x80] sm:$0xff] %v3378_v30  ;;  %v3381_v36 = vadd.f32 %v4714_v56, %v1225_v5 }
 0x1fa   : > { %v2153_v52 = vpop.f32.mrb[19].mxu0  ;;  %v3380_v48 = vadd.f32 %v3379_v0, %v3132_v23 }
 0x1fb   : > { %v3382_v22 = vadd.f32 %v3381_v36, %v2153_v52  ;;  %v2895_v19 = vpop.f32.mrb[20].mxu1 }
 0x1fc   : > { %2254 = vst [vmem:[%s4720_s8 + $0x98] sm:$0xff] %v3380_v48  ;;  %v3383_v35 = vadd.f32 %v2895_v19, %v4714_v56  ;;  %v1239_v55 = vpop.f32.mrb[21].mxu1 }
 0x1fd   : > { %v3135_v57 = vpop.f32.mrb[20].mxu0  ;;  %2253 = vst [vmem:[%s4720_s8 + $0x90] sm:$0xff] %v3382_v22  ;;  %v3385_v39 = vadd.f32 %v4714_v56, %v1239_v55 }
 0x1fe   : > { %v2165_v49 = vpop.f32.mrb[21].mxu0  ;;  %v3384_v28 = vadd.f32 %v3383_v35, %v3135_v57 }
 0x1ff   : > { %v3386_v41 = vadd.f32 %v3385_v39, %v2165_v49  ;;  %v2898_v27 = vpop.f32.mrb[22].mxu1 }
 0x200   : > { %2256 = vst [vmem:[%s4720_s8 + $0xa8] sm:$0xff] %v3384_v28  ;;  %v3387_v46 = vadd.f32 %v2898_v27, %v4714_v56  ;;  %v1253_v31 = vpop.f32.mrb[23].mxu1 }
 0x201   : > { %v3138_v61 = vpop.f32.mrb[22].mxu0  ;;  %2255 = vst [vmem:[%s4720_s8 + $0xa0] sm:$0xff] %v3386_v41  ;;  %v3389_v21 = vadd.f32 %v4714_v56, %v1253_v31 }
 0x202   : > { %v2177_v10 = vpop.f32.mrb[23].mxu0  ;;  %v3388_v47 = vadd.f32 %v3387_v46, %v3138_v61 }
 0x203   : > { %v3390_v13 = vadd.f32 %v3389_v21, %v2177_v10  ;;  %v2901_v15 = vpop.f32.mrb[24].mxu1 }
 0x204   : > { %2258 = vst [vmem:[%s4720_s8 + $0xb8] sm:$0xff] %v3388_v47  ;;  %v3391_v18 = vadd.f32 %v2901_v15, %v4714_v56  ;;  %v1267_v54 = vpop.f32.mrb[25].mxu1 }
 0x205   : > { %v3141_v51 = vpop.f32.mrb[24].mxu0  ;;  %2257 = vst [vmem:[%s4720_s8 + $0xb0] sm:$0xff] %v3390_v13  ;;  %v3393_v44 = vadd.f32 %v4714_v56, %v1267_v54 }
 0x206   : > { %v2189_v11 = vpop.f32.mrb[25].mxu0  ;;  %v3392_v38 = vadd.f32 %v3391_v18, %v3141_v51 }
 0x207   : > { %v3394_v58 = vadd.f32 %v3393_v44, %v2189_v11  ;;  %v2904_v32 = vpop.f32.mrb[26].mxu1 }
 0x208   : > { %2260 = vst [vmem:[%s4720_s8 + $0xc8] sm:$0xff] %v3392_v38  ;;  %v3395_v37 = vadd.f32 %v2904_v32, %v4714_v56  ;;  %v1281_v40 = vpop.f32.mrb[27].mxu1 }
 0x209   : > { %v3144_v34 = vpop.f32.mrb[26].mxu0  ;;  %2259 = vst [vmem:[%s4720_s8 + $0xc0] sm:$0xff] %v3394_v58  ;;  %v3397_v60 = vadd.f32 %v4714_v56, %v1281_v40 }
 0x20a   : > { %v2201_v16 = vpop.f32.mrb[27].mxu0  ;;  %v3396_v42 = vadd.f32 %v3395_v37, %v3144_v34 }
 0x20b   : > { %v3398_v9 = vadd.f32 %v3397_v60, %v2201_v16  ;;  %v2907_v1 = vpop.f32.mrb[28].mxu1 }
 0x20c   : > { %2262 = vst [vmem:[%s4720_s8 + $0xd8] sm:$0xff] %v3396_v42  ;;  %v3399_v17 = vadd.f32 %v2907_v1, %v4714_v56  ;;  %v1295_v33 = vpop.f32.mrb[29].mxu1 }
 0x20d   : > { %v3147_v20 = vpop.f32.mrb[28].mxu0  ;;  %2261 = vst [vmem:[%s4720_s8 + $0xd0] sm:$0xff] %v3398_v9  ;;  %v3401_v45 = vadd.f32 %v4714_v56, %v1295_v33 }
 0x20e   : > { %v2213_v43 = vpop.f32.mrb[29].mxu0  ;;  %v3400_v53 = vadd.f32 %v3399_v17, %v3147_v20 }
 0x20f   : > { %v3402_v6 = vadd.f32 %v3401_v45, %v2213_v43  ;;  %v2910_v4 = vpop.f32.mrb[30].mxu1 }
 0x210   : > { %2264 = vst [vmem:[%s4720_s8 + $0xe8] sm:$0xff] %v3400_v53  ;;  %v3403_v25 = vadd.f32 %v2910_v4, %v4714_v56  ;;  %v1309_v8 = vpop.f32.mrb[31].mxu1 }
 0x211   : > { %v3150_v2 = vpop.f32.mrb[30].mxu0  ;;  %2263 = vst [vmem:[%s4720_s8 + $0xe0] sm:$0xff] %v3402_v6  ;;  %v3405_v12 = vadd.f32 %v4714_v56, %v1309_v8 }
 0x212   : > { %v2225_v24 = vpop.f32.mrb[31].mxu0  ;;  %v3404_v14 = vadd.f32 %v3403_v25, %v3150_v2 }
 0x213   : > { %v3406_v7 = vadd.f32 %v3405_v12, %v2225_v24 }
 0x214   : > { %2266 = vst [vmem:[%s4720_s8 + $0xf8] sm:$0xff] %v3404_v14 }
 0x215   : > { %2265 = vst [vmem:[%s4720_s8 + $0xf0] sm:$0xff] %v3406_v7 }
 0x216   : > { %3667 = shalt.err (!%p3664_p7)
}
 0x217   : > { %s3668_s30 = scalar_lea.hbm %s4787_s11, 4096  ;;  %s3672_s10 = scalar_lea.hbm %s4838_s3, 8192 }
 0x218   : > { %p3669_p9 = scmp.ne.s32.totalorder %s4787_s11, %s3668_s30  ;;  %p3673_p5 = scmp.lt.u32.totalorder %s4787_s11, %s4838_s3 }
 0x219   : > { %p3674_p11 = scmp.lt.u32.totalorder %s3672_s10, %s3668_s30  ;;  %p3676_p4 = scmp.lt.u32.totalorder %s3668_s30, %s4787_s11 }
 0x21a   : > { %p3670_p1 = pnand %p3669_p9, %p3847_p12 }
 0x21b   : > { %p3675_p2 = por %p3674_p11, %p3673_p5 }
 0x21c   : > { %p3671_p0 = pneg %p3670_p1 }
 0x21d   : > { %p3677_p6 = por %p3676_p4, %p3675_p2 }
 0x21f   : > { %p3678_p8 = pnand %p3677_p6, %p3671_p0 }
 0x221   : > { %3681 = shalt.err (!%p3678_p8)
}
 0x222   : > { %s3731_s20 = smov 128   ;;  %s3732_s8 = smov 8  }
 0x223   : > { %3541 = dma.vmem_to_hbm [thread:$0]  (%p3847_p12), %s4789_s4, 4096, %s4787_s11, %s2268_s16, %s3731_s20, %s3731_s20, %s3732_s8  }
 0x224 PF: > { %s2296_s9 = sand.u32 1, %s3712_s12   ;;  %p5039_p10 = scmp.ne.s32.totalorder %s4908_s19, 0 }
 0x225   : > { %p5040_p13 = scmp.ge.s32.totalorder %s3724_s15, 2  ;;  %s2297_s25 = scalar_lea.sflag [#allocation4], %s2296_s9 }
 0x227   : > { %p3552_p3 = pnand %p5040_p13, %p5039_p10 }
 0x229   : > { %3707 = dma.done.wait (!%p3552_p3), %s2297_s25, 4096  }
 0x22a   : > { %3709 = vsyncadd (!%p3552_p3), %s2297_s25, 4294963200  ;;  %p17_p7 = scmp.ge.s32.totalorder %s3809_s24, 4   ;;  %s5041_s12 = smov %s3716_s13 }
 0x22b   : > { %s5042_s13 = smov %s3720_s14  ;;  %s5043_s14 = smov %s3843_s17 }
 0x22c   : > { %s5044_s15 = smov %s3809_s24  ;;  %19 = sbr.rel (!%p17_p7) target bundleno = 6 (0x6), region = 81 }
 0x233   :  { %2302 = vsyncpa [#allocation3], 1 }
 0x234   :  { %2304 = vsyncpa [#allocation3 + $0x1], 1 }
 0x235   :  { %2305 = vsyncpa [#allocation6], 1 }
 0x236   :  { %2306 = vsyncpa [#allocation4], 1 }
 0x237   :  { %2308 = vsyncpa [#allocation4 + $0x1], 1 }

</bundles_post_ra>
